<compile_context>
chip_gen: v6e
topology: v6e:2x2x1
jax: 0.10.0
libtpu: 0.0.40
codegen_flags: <defaults>
</compile_context>

<pallas_src>
import functools

import jax
import jax.numpy as jnp
import numpy as np
from jax import lax
from jax.experimental import pallas as pl
from jax.experimental.pallas import tpu as pltpu


def _round_up(x, m):
    return ((x + m - 1) // m) * m


def _attention_lstm_kernel(support_ref, support_t_ref, queries_ref,
                           w_ih_t_ref, w_hh_t_ref, bias_ref, out_ref,
                           *, unrolling_steps, s_valid, dp):
    support = support_ref[...]           # (SP, DP)  zero-padded support set
    support_t = support_t_ref[...]       # (DP, SP)  pre-transposed on host
    q = queries_ref[...]                 # (Bt, DP)  this grid tile's queries
    w_ih_t = w_ih_t_ref[...]             # (DP, 4*DP) gate-blocked, lane-aligned
    w_hh_t = w_hh_t_ref[...]             # (DP, 4*DP)
    bias = bias_ref[...]                 # (1, 4*DP)  b_ih + b_hh, gate-blocked

    sp = support.shape[0]

    # Loop invariants, hoisted out of the unroll:
    #   - input-gate pre-activations (queries @ W_ih^T + bias)
    #   - softmax mask for the zero-padded support rows
    gates_ih = jnp.dot(q, w_ih_t, preferred_element_type=jnp.float32) + bias
    col = lax.broadcasted_iota(jnp.int32, (1, sp), 1)
    neg_mask = jnp.where(col < s_valid, 0.0, -1e30).astype(jnp.float32)

    def step(h_hat, c):
        h = h_hat + q

        # attentions = softmax(h @ support.T) over the valid support rows.
        logits = jnp.dot(h, support_t, preferred_element_type=jnp.float32)
        logits = logits + neg_mask
        logits = logits - jnp.max(logits, axis=-1, keepdims=True)   # XLU
        p = jnp.exp(logits)                                         # EUP
        denom = jnp.sum(p, axis=-1, keepdims=True)                  # XLU
        r = pl.reciprocal(denom, approx=True)                       # EUP slot
        r = r * (2.0 - denom * r)                                   # Newton -> ~exact f32
        attn = p * r

        # readout = attn @ support
        readout = jnp.dot(attn, support, preferred_element_type=jnp.float32)

        # LSTMCell(queries, (h + readout, c)); only the W_hh matmul per step.
        hx = h + readout
        gates = gates_ih + jnp.dot(hx, w_hh_t, preferred_element_type=jnp.float32)

        # Gate slices are 128-lane aligned static slices (dp % 128 == 0).
        i_g = jax.nn.sigmoid(gates[:, 0 * dp:1 * dp])
        f_g = jax.nn.sigmoid(gates[:, 1 * dp:2 * dp])
        g_g = jnp.tanh(gates[:, 2 * dp:3 * dp])
        o_g = jax.nn.sigmoid(gates[:, 3 * dp:4 * dp])

        c_new = f_g * c + i_g * g_g
        h_hat_new = o_g * jnp.tanh(c_new)
        return h_hat_new, c_new

    h_hat = jnp.zeros_like(q)
    c = jnp.zeros_like(q)
    if unrolling_steps <= 8:
        # Small static trip count: full unroll gives the LLO scheduler visibility.
        for _ in range(unrolling_steps):
            h_hat, c = step(h_hat, c)
    else:
        # Large trip counts: bound live ranges / register pressure.
        h_hat, c = lax.fori_loop(0, unrolling_steps,
                                 lambda _, hc: step(*hc), (h_hat, c))

    out_ref[...] = (h_hat + q).astype(out_ref.dtype)   # lane-dense, unmasked store


def attention_lstm_forward(support, queries, w_ih, w_hh, b_ih, b_hh,
                           *, unrolling_steps):
    """support: (S, D), queries: (B, D). LSTMCell params in PyTorch layout:
    w_ih: (4D, D), w_hh: (4D, D), b_ih: (4D,), b_hh: (4D,)."""
    if support.shape[-1] != queries.shape[-1]:
        raise ValueError('Support and query set have different embedding dimension!')
    B, D = queries.shape
    S = support.shape[0]

    DP = _round_up(D, 128)                 # lane-dense embedding dim
    SP = _round_up(S, 128)                 # lane-dense support count (masked in-kernel)
    block_b = 256 if B > 256 else _round_up(B, 8)
    BP = _round_up(B, block_b)

    f32 = jnp.float32
    support = jnp.asarray(support, f32)
    queries = jnp.asarray(queries, f32)

    support_p = jnp.zeros((SP, DP), f32).at[:S, :D].set(support)
    support_t_p = support_p.T                         # host-side transpose, done once
    queries_p = jnp.zeros((BP, DP), f32).at[:B, :D].set(queries)

    # Gate-blocked, lane-aligned weight layout: gate g (PyTorch order i, f, g, o)
    # occupies lanes [g*DP, g*DP + D) of the (.., 4*DP) gate tensor.
    def pack_w(w):                                    # (4D, D) -> (DP, 4*DP)
        w4 = jnp.asarray(w, f32).reshape(4, D, D)     # (gate, out, in)
        w4t = jnp.transpose(w4, (2, 0, 1))            # (in, gate, out)
        return (jnp.zeros((DP, 4, DP), f32).at[:D, :, :D].set(w4t)
                .reshape(DP, 4 * DP))

    w_ih_t_p = pack_w(w_ih)
    w_hh_t_p = pack_w(w_hh)

    b = (jnp.asarray(b_ih, f32) + jnp.asarray(b_hh, f32)).reshape(4, D)
    bias_p = jnp.zeros((4, DP), f32).at[:, :D].set(b).reshape(1, 4 * DP)

    kernel = functools.partial(_attention_lstm_kernel,
                               unrolling_steps=unrolling_steps,
                               s_valid=S, dp=DP)

    resident = lambda shp: pl.BlockSpec(shp, lambda i: (0,) * len(shp))
    out_p = pl.pallas_call(
        kernel,
        out_shape=jax.ShapeDtypeStruct((BP, DP), f32),
        grid=(BP // block_b,),
        in_specs=[
            resident((SP, DP)),                             # support
            resident((DP, SP)),                             # support^T
            pl.BlockSpec((block_b, DP), lambda i: (i, 0)),  # queries (tiled over B)
            resident((DP, 4 * DP)),                         # W_ih^T (gate-blocked)
            resident((DP, 4 * DP)),                         # W_hh^T (gate-blocked)
            resident((1, 4 * DP)),                          # b_ih + b_hh
        ],
        out_specs=pl.BlockSpec((block_b, DP), lambda i: (i, 0)),
        compiler_params=pltpu.CompilerParams(
            dimension_semantics=("parallel",)),
    )(support_p, support_t_p, queries_p, w_ih_t_p, w_hh_t_p, bias_p)

    return out_p[:B, :D]


def _reference(support, queries, w_ih, w_hh, b_ih, b_hh, unrolling_steps):
    """Pure-JAX reference of the PyTorch forward (f32)."""
    support = jnp.asarray(support, jnp.float32)
    queries = jnp.asarray(queries, jnp.float32)
    D = queries.shape[1]
    h_hat = jnp.zeros_like(queries)
    c = jnp.zeros_like(queries)
    for _ in range(unrolling_steps):
        h = h_hat + queries
        attn = jax.nn.softmax(h @ support.T, axis=1)
        readout = attn @ support
        hx = h + readout
        gates = queries @ w_ih.T + b_ih + hx @ w_hh.T + b_hh
        i_g = jax.nn.sigmoid(gates[:, 0 * D:1 * D])
        f_g = jax.nn.sigmoid(gates[:, 1 * D:2 * D])
        g_g = jnp.tanh(gates[:, 2 * D:3 * D])
        o_g = jax.nn.sigmoid(gates[:, 3 * D:4 * D])
        c = f_g * c + i_g * g_g
        h_hat = o_g * jnp.tanh(c)
    return h_hat + queries


if __name__ == "__main__":
    SIZE = 32            # embedding / hidden dim
    UNROLLING_STEPS = 3
    B = 8                # number of queries
    S = 16               # number of support samples

    key = jax.random.PRNGKey(0)
    k_sup, k_qry, k_wih, k_whh, k_bih, k_bhh = jax.random.split(key, 6)

    support = jax.random.normal(k_sup, (S, SIZE), jnp.float32)
    queries = jax.random.normal(k_qry, (B, SIZE), jnp.float32)

    # Deterministic LSTMCell params, PyTorch-style uniform(-1/sqrt(H), 1/sqrt(H)).
    bound = 1.0 / np.sqrt(SIZE)
    w_ih = jax.random.uniform(k_wih, (4 * SIZE, SIZE), jnp.float32, -bound, bound)
    w_hh = jax.random.uniform(k_whh, (4 * SIZE, SIZE), jnp.float32, -bound, bound)
    b_ih = jax.random.uniform(k_bih, (4 * SIZE,), jnp.float32, -bound, bound)
    b_hh = jax.random.uniform(k_bhh, (4 * SIZE,), jnp.float32, -bound, bound)

    out = attention_lstm_forward(support, queries, w_ih, w_hh, b_ih, b_hh,
                                 unrolling_steps=UNROLLING_STEPS)
    out = jax.block_until_ready(out)

    ref = _reference(support, queries, w_ih, w_hh, b_ih, b_hh, UNROLLING_STEPS)
    np.testing.assert_allclose(np.asarray(out), np.asarray(ref), rtol=1e-5, atol=1e-5)

    print("KERNEL_OK")
</pallas_src>

<mosaic_0001>
module attributes {stable_mosaic.version = 11 : i64} {
  func.func @_attention_lstm_kernel(%arg0: i32, %arg1: memref<128x128xf32, #tpu.memory_space<vmem>>, %arg2: memref<128x128xf32, #tpu.memory_space<vmem>>, %arg3: memref<8x128xf32, #tpu.memory_space<vmem>>, %arg4: memref<128x512xf32, #tpu.memory_space<vmem>>, %arg5: memref<128x512xf32, #tpu.memory_space<vmem>>, %arg6: memref<1x512xf32, #tpu.memory_space<vmem>>, %arg7: memref<8x128xf32, #tpu.memory_space<vmem>>) attributes {dimension_semantics = [#tpu.dimension_semantics<parallel>], iteration_bounds = array<i64: 1>, scalar_prefetch = 0 : i64, scratch_operands = 0 : i64, tpu.core_type = #tpu.core_type<tc>, window_params = [{pipeline_mode = #tpu.pipeline_mode<synchronous>, transform_indices = @transform_0, window_bounds = array<i64: 128, 128>}, {pipeline_mode = #tpu.pipeline_mode<synchronous>, transform_indices = @transform_1, window_bounds = array<i64: 128, 128>}, {transform_indices = @transform_2, window_bounds = array<i64: 8, 128>}, {pipeline_mode = #tpu.pipeline_mode<synchronous>, transform_indices = @transform_3, window_bounds = array<i64: 128, 512>}, {pipeline_mode = #tpu.pipeline_mode<synchronous>, transform_indices = @transform_4, window_bounds = array<i64: 128, 512>}, {pipeline_mode = #tpu.pipeline_mode<synchronous>, transform_indices = @transform_5, window_bounds = array<i64: 1, 512>}, {transform_indices = @transform_6, window_bounds = array<i64: 8, 128>}]} {
    %c0 = arith.constant 0 : index
    %c0_0 = arith.constant 0 : index
    %0 = vector.load %arg1[%c0, %c0_0] : memref<128x128xf32, #tpu.memory_space<vmem>>, vector<128x128xf32>
    %c0_1 = arith.constant 0 : index
    %c0_2 = arith.constant 0 : index
    %1 = vector.load %arg2[%c0_1, %c0_2] : memref<128x128xf32, #tpu.memory_space<vmem>>, vector<128x128xf32>
    %c0_3 = arith.constant 0 : index
    %c0_4 = arith.constant 0 : index
    %2 = vector.load %arg3[%c0_3, %c0_4] : memref<8x128xf32, #tpu.memory_space<vmem>>, vector<8x128xf32>
    %c0_5 = arith.constant 0 : index
    %c0_6 = arith.constant 0 : index
    %3 = vector.load %arg4[%c0_5, %c0_6] : memref<128x512xf32, #tpu.memory_space<vmem>>, vector<128x512xf32>
    %c0_7 = arith.constant 0 : index
    %c0_8 = arith.constant 0 : index
    %4 = vector.load %arg5[%c0_7, %c0_8] : memref<128x512xf32, #tpu.memory_space<vmem>>, vector<128x512xf32>
    %c0_9 = arith.constant 0 : index
    %c0_10 = arith.constant 0 : index
    %5 = vector.load %arg6[%c0_9, %c0_10] : memref<1x512xf32, #tpu.memory_space<vmem>>, vector<1x512xf32>
    %cst = arith.constant dense<0.000000e+00> : vector<8x512xf32>
    %6 = tpu.matmul %2, %3, %cst {dimension_numbers = #tpu.dot_dimension_numbers<[1], [0], [0], [1], [0, 0, 1, 1], [], []>} : vector<8x128xf32>, vector<128x512xf32>, vector<8x512xf32> -> vector<8x512xf32>
    %7 = vector.broadcast %5 : vector<1x512xf32> to vector<8x512xf32>
    %8 = arith.addf %6, %7 : vector<8x512xf32>
    %9 = tpu.iota {dimensions = array<i32: 1>} : vector<1x128xi32>
    %c16_i32 = arith.constant 16 : i32
    %10 = vector.broadcast %c16_i32 : i32 to vector<1x128xi32>
    %11 = arith.cmpi slt, %9, %10 : vector<1x128xi32>
    %cst_11 = arith.constant 0.000000e+00 : f32
    %cst_12 = arith.constant -1.000000e+30 : f32
    %12 = vector.broadcast %cst_11 : f32 to vector<1x128xf32>
    %13 = vector.broadcast %cst_12 : f32 to vector<1x128xf32>
    %14 = arith.select %11, %12, %13 : vector<1x128xi1>, vector<1x128xf32>
    %cst_13 = arith.constant 0.000000e+00 : f32
    %15 = vector.broadcast %cst_13 : f32 to vector<8x128xf32>
    %cst_14 = arith.constant 0.000000e+00 : f32
    %16 = vector.broadcast %cst_14 : f32 to vector<8x128xf32>
    %17 = arith.addf %15, %2 : vector<8x128xf32>
    %cst_15 = arith.constant dense<0.000000e+00> : vector<8x128xf32>
    %18 = tpu.matmul %17, %1, %cst_15 {dimension_numbers = #tpu.dot_dimension_numbers<[1], [0], [0], [1], [0, 0, 1, 1], [], []>} : vector<8x128xf32>, vector<128x128xf32>, vector<8x128xf32> -> vector<8x128xf32>
    %19 = vector.broadcast %14 : vector<1x128xf32> to vector<8x128xf32>
    %20 = arith.addf %18, %19 : vector<8x128xf32>
    %cst_16 = arith.constant dense<0xFF800000> : vector<8xf32>
    %21 = vector.multi_reduction <maximumf>, %20, %cst_16 [1] : vector<8x128xf32> to vector<8xf32>
    %22 = vector.shape_cast %21 : vector<8xf32> to vector<8x1xf32>
    %23 = vector.broadcast %22 : vector<8x1xf32> to vector<8x128xf32>
    %24 = arith.subf %20, %23 : vector<8x128xf32>
    %25 = math.exp %24 : vector<8x128xf32>
    %cst_17 = arith.constant dense<0.000000e+00> : vector<8xf32>
    %26 = vector.multi_reduction <add>, %25, %cst_17 [1] : vector<8x128xf32> to vector<8xf32>
    %27 = vector.shape_cast %26 : vector<8xf32> to vector<8x1xf32>
    %28 = tpu.reciprocal %27 {approx = true} : vector<8x1xf32> -> vector<8x1xf32>
    %29 = arith.mulf %27, %28 : vector<8x1xf32>
    %cst_18 = arith.constant 2.000000e+00 : f32
    %30 = vector.broadcast %cst_18 : f32 to vector<8x1xf32>
    %31 = arith.subf %30, %29 : vector<8x1xf32>
    %32 = arith.mulf %28, %31 : vector<8x1xf32>
    %33 = vector.broadcast %32 : vector<8x1xf32> to vector<8x128xf32>
    %34 = arith.mulf %25, %33 : vector<8x128xf32>
    %cst_19 = arith.constant dense<0.000000e+00> : vector<8x128xf32>
    %35 = tpu.matmul %34, %0, %cst_19 {dimension_numbers = #tpu.dot_dimension_numbers<[1], [0], [0], [1], [0, 0, 1, 1], [], []>} : vector<8x128xf32>, vector<128x128xf32>, vector<8x128xf32> -> vector<8x128xf32>
    %36 = arith.addf %17, %35 : vector<8x128xf32>
    %cst_20 = arith.constant dense<0.000000e+00> : vector<8x512xf32>
    %37 = tpu.matmul %36, %4, %cst_20 {dimension_numbers = #tpu.dot_dimension_numbers<[1], [0], [0], [1], [0, 0, 1, 1], [], []>} : vector<8x128xf32>, vector<128x512xf32>, vector<8x512xf32> -> vector<8x512xf32>
    %38 = arith.addf %8, %37 : vector<8x512xf32>
    %39 = vector.extract_strided_slice %38 {offsets = [0, 0], sizes = [8, 128], strides = [1, 1]} : vector<8x512xf32> to vector<8x128xf32>
    %40 = arith.negf %39 : vector<8x128xf32>
    %41 = math.exp %40 : vector<8x128xf32>
    %cst_21 = arith.constant 1.000000e+00 : f32
    %42 = vector.broadcast %cst_21 : f32 to vector<8x128xf32>
    %43 = arith.addf %42, %41 : vector<8x128xf32>
    %44 = arith.divf %42, %43 : vector<8x128xf32>
    %45 = vector.extract_strided_slice %38 {offsets = [0, 128], sizes = [8, 128], strides = [1, 1]} : vector<8x512xf32> to vector<8x128xf32>
    %46 = arith.negf %45 : vector<8x128xf32>
    %47 = math.exp %46 : vector<8x128xf32>
    %cst_22 = arith.constant 1.000000e+00 : f32
    %48 = vector.broadcast %cst_22 : f32 to vector<8x128xf32>
    %49 = arith.addf %48, %47 : vector<8x128xf32>
    %50 = arith.divf %48, %49 : vector<8x128xf32>
    %51 = vector.extract_strided_slice %38 {offsets = [0, 256], sizes = [8, 128], strides = [1, 1]} : vector<8x512xf32> to vector<8x128xf32>
    %52 = math.tanh %51 : vector<8x128xf32>
    %53 = vector.extract_strided_slice %38 {offsets = [0, 384], sizes = [8, 128], strides = [1, 1]} : vector<8x512xf32> to vector<8x128xf32>
    %54 = arith.negf %53 : vector<8x128xf32>
    %55 = math.exp %54 : vector<8x128xf32>
    %cst_23 = arith.constant 1.000000e+00 : f32
    %56 = vector.broadcast %cst_23 : f32 to vector<8x128xf32>
    %57 = arith.addf %56, %55 : vector<8x128xf32>
    %58 = arith.divf %56, %57 : vector<8x128xf32>
    %59 = arith.mulf %50, %16 : vector<8x128xf32>
    %60 = arith.mulf %44, %52 : vector<8x128xf32>
    %61 = arith.addf %59, %60 : vector<8x128xf32>
    %62 = math.tanh %61 : vector<8x128xf32>
    %63 = arith.mulf %58, %62 : vector<8x128xf32>
    %64 = arith.addf %63, %2 : vector<8x128xf32>
    %cst_24 = arith.constant dense<0.000000e+00> : vector<8x128xf32>
    %65 = tpu.matmul %64, %1, %cst_24 {dimension_numbers = #tpu.dot_dimension_numbers<[1], [0], [0], [1], [0, 0, 1, 1], [], []>} : vector<8x128xf32>, vector<128x128xf32>, vector<8x128xf32> -> vector<8x128xf32>
    %66 = vector.broadcast %14 : vector<1x128xf32> to vector<8x128xf32>
    %67 = arith.addf %65, %66 : vector<8x128xf32>
    %cst_25 = arith.constant dense<0xFF800000> : vector<8xf32>
    %68 = vector.multi_reduction <maximumf>, %67, %cst_25 [1] : vector<8x128xf32> to vector<8xf32>
    %69 = vector.shape_cast %68 : vector<8xf32> to vector<8x1xf32>
    %70 = vector.broadcast %69 : vector<8x1xf32> to vector<8x128xf32>
    %71 = arith.subf %67, %70 : vector<8x128xf32>
    %72 = math.exp %71 : vector<8x128xf32>
    %cst_26 = arith.constant dense<0.000000e+00> : vector<8xf32>
    %73 = vector.multi_reduction <add>, %72, %cst_26 [1] : vector<8x128xf32> to vector<8xf32>
    %74 = vector.shape_cast %73 : vector<8xf32> to vector<8x1xf32>
    %75 = tpu.reciprocal %74 {approx = true} : vector<8x1xf32> -> vector<8x1xf32>
    %76 = arith.mulf %74, %75 : vector<8x1xf32>
    %cst_27 = arith.constant 2.000000e+00 : f32
    %77 = vector.broadcast %cst_27 : f32 to vector<8x1xf32>
    %78 = arith.subf %77, %76 : vector<8x1xf32>
    %79 = arith.mulf %75, %78 : vector<8x1xf32>
    %80 = vector.broadcast %79 : vector<8x1xf32> to vector<8x128xf32>
    %81 = arith.mulf %72, %80 : vector<8x128xf32>
    %cst_28 = arith.constant dense<0.000000e+00> : vector<8x128xf32>
    %82 = tpu.matmul %81, %0, %cst_28 {dimension_numbers = #tpu.dot_dimension_numbers<[1], [0], [0], [1], [0, 0, 1, 1], [], []>} : vector<8x128xf32>, vector<128x128xf32>, vector<8x128xf32> -> vector<8x128xf32>
    %83 = arith.addf %64, %82 : vector<8x128xf32>
    %cst_29 = arith.constant dense<0.000000e+00> : vector<8x512xf32>
    %84 = tpu.matmul %83, %4, %cst_29 {dimension_numbers = #tpu.dot_dimension_numbers<[1], [0], [0], [1], [0, 0, 1, 1], [], []>} : vector<8x128xf32>, vector<128x512xf32>, vector<8x512xf32> -> vector<8x512xf32>
    %85 = arith.addf %8, %84 : vector<8x512xf32>
    %86 = vector.extract_strided_slice %85 {offsets = [0, 0], sizes = [8, 128], strides = [1, 1]} : vector<8x512xf32> to vector<8x128xf32>
    %87 = arith.negf %86 : vector<8x128xf32>
    %88 = math.exp %87 : vector<8x128xf32>
    %cst_30 = arith.constant 1.000000e+00 : f32
    %89 = vector.broadcast %cst_30 : f32 to vector<8x128xf32>
    %90 = arith.addf %89, %88 : vector<8x128xf32>
    %91 = arith.divf %89, %90 : vector<8x128xf32>
    %92 = vector.extract_strided_slice %85 {offsets = [0, 128], sizes = [8, 128], strides = [1, 1]} : vector<8x512xf32> to vector<8x128xf32>
    %93 = arith.negf %92 : vector<8x128xf32>
    %94 = math.exp %93 : vector<8x128xf32>
    %cst_31 = arith.constant 1.000000e+00 : f32
    %95 = vector.broadcast %cst_31 : f32 to vector<8x128xf32>
    %96 = arith.addf %95, %94 : vector<8x128xf32>
    %97 = arith.divf %95, %96 : vector<8x128xf32>
    %98 = vector.extract_strided_slice %85 {offsets = [0, 256], sizes = [8, 128], strides = [1, 1]} : vector<8x512xf32> to vector<8x128xf32>
    %99 = math.tanh %98 : vector<8x128xf32>
    %100 = vector.extract_strided_slice %85 {offsets = [0, 384], sizes = [8, 128], strides = [1, 1]} : vector<8x512xf32> to vector<8x128xf32>
    %101 = arith.negf %100 : vector<8x128xf32>
    %102 = math.exp %101 : vector<8x128xf32>
    %cst_32 = arith.constant 1.000000e+00 : f32
    %103 = vector.broadcast %cst_32 : f32 to vector<8x128xf32>
    %104 = arith.addf %103, %102 : vector<8x128xf32>
    %105 = arith.divf %103, %104 : vector<8x128xf32>
    %106 = arith.mulf %97, %61 : vector<8x128xf32>
    %107 = arith.mulf %91, %99 : vector<8x128xf32>
    %108 = arith.addf %106, %107 : vector<8x128xf32>
    %109 = math.tanh %108 : vector<8x128xf32>
    %110 = arith.mulf %105, %109 : vector<8x128xf32>
    %111 = arith.addf %110, %2 : vector<8x128xf32>
    %cst_33 = arith.constant dense<0.000000e+00> : vector<8x128xf32>
    %112 = tpu.matmul %111, %1, %cst_33 {dimension_numbers = #tpu.dot_dimension_numbers<[1], [0], [0], [1], [0, 0, 1, 1], [], []>} : vector<8x128xf32>, vector<128x128xf32>, vector<8x128xf32> -> vector<8x128xf32>
    %113 = vector.broadcast %14 : vector<1x128xf32> to vector<8x128xf32>
    %114 = arith.addf %112, %113 : vector<8x128xf32>
    %cst_34 = arith.constant dense<0xFF800000> : vector<8xf32>
    %115 = vector.multi_reduction <maximumf>, %114, %cst_34 [1] : vector<8x128xf32> to vector<8xf32>
    %116 = vector.shape_cast %115 : vector<8xf32> to vector<8x1xf32>
    %117 = vector.broadcast %116 : vector<8x1xf32> to vector<8x128xf32>
    %118 = arith.subf %114, %117 : vector<8x128xf32>
    %119 = math.exp %118 : vector<8x128xf32>
    %cst_35 = arith.constant dense<0.000000e+00> : vector<8xf32>
    %120 = vector.multi_reduction <add>, %119, %cst_35 [1] : vector<8x128xf32> to vector<8xf32>
    %121 = vector.shape_cast %120 : vector<8xf32> to vector<8x1xf32>
    %122 = tpu.reciprocal %121 {approx = true} : vector<8x1xf32> -> vector<8x1xf32>
    %123 = arith.mulf %121, %122 : vector<8x1xf32>
    %cst_36 = arith.constant 2.000000e+00 : f32
    %124 = vector.broadcast %cst_36 : f32 to vector<8x1xf32>
    %125 = arith.subf %124, %123 : vector<8x1xf32>
    %126 = arith.mulf %122, %125 : vector<8x1xf32>
    %127 = vector.broadcast %126 : vector<8x1xf32> to vector<8x128xf32>
    %128 = arith.mulf %119, %127 : vector<8x128xf32>
    %cst_37 = arith.constant dense<0.000000e+00> : vector<8x128xf32>
    %129 = tpu.matmul %128, %0, %cst_37 {dimension_numbers = #tpu.dot_dimension_numbers<[1], [0], [0], [1], [0, 0, 1, 1], [], []>} : vector<8x128xf32>, vector<128x128xf32>, vector<8x128xf32> -> vector<8x128xf32>
    %130 = arith.addf %111, %129 : vector<8x128xf32>
    %cst_38 = arith.constant dense<0.000000e+00> : vector<8x512xf32>
    %131 = tpu.matmul %130, %4, %cst_38 {dimension_numbers = #tpu.dot_dimension_numbers<[1], [0], [0], [1], [0, 0, 1, 1], [], []>} : vector<8x128xf32>, vector<128x512xf32>, vector<8x512xf32> -> vector<8x512xf32>
    %132 = arith.addf %8, %131 : vector<8x512xf32>
    %133 = vector.extract_strided_slice %132 {offsets = [0, 0], sizes = [8, 128], strides = [1, 1]} : vector<8x512xf32> to vector<8x128xf32>
    %134 = arith.negf %133 : vector<8x128xf32>
    %135 = math.exp %134 : vector<8x128xf32>
    %cst_39 = arith.constant 1.000000e+00 : f32
    %136 = vector.broadcast %cst_39 : f32 to vector<8x128xf32>
    %137 = arith.addf %136, %135 : vector<8x128xf32>
    %138 = arith.divf %136, %137 : vector<8x128xf32>
    %139 = vector.extract_strided_slice %132 {offsets = [0, 128], sizes = [8, 128], strides = [1, 1]} : vector<8x512xf32> to vector<8x128xf32>
    %140 = arith.negf %139 : vector<8x128xf32>
    %141 = math.exp %140 : vector<8x128xf32>
    %cst_40 = arith.constant 1.000000e+00 : f32
    %142 = vector.broadcast %cst_40 : f32 to vector<8x128xf32>
    %143 = arith.addf %142, %141 : vector<8x128xf32>
    %144 = arith.divf %142, %143 : vector<8x128xf32>
    %145 = vector.extract_strided_slice %132 {offsets = [0, 256], sizes = [8, 128], strides = [1, 1]} : vector<8x512xf32> to vector<8x128xf32>
    %146 = math.tanh %145 : vector<8x128xf32>
    %147 = vector.extract_strided_slice %132 {offsets = [0, 384], sizes = [8, 128], strides = [1, 1]} : vector<8x512xf32> to vector<8x128xf32>
    %148 = arith.negf %147 : vector<8x128xf32>
    %149 = math.exp %148 : vector<8x128xf32>
    %cst_41 = arith.constant 1.000000e+00 : f32
    %150 = vector.broadcast %cst_41 : f32 to vector<8x128xf32>
    %151 = arith.addf %150, %149 : vector<8x128xf32>
    %152 = arith.divf %150, %151 : vector<8x128xf32>
    %153 = arith.mulf %144, %108 : vector<8x128xf32>
    %154 = arith.mulf %138, %146 : vector<8x128xf32>
    %155 = arith.addf %153, %154 : vector<8x128xf32>
    %156 = math.tanh %155 : vector<8x128xf32>
    %157 = arith.mulf %152, %156 : vector<8x128xf32>
    %158 = arith.addf %157, %2 : vector<8x128xf32>
    %c0_42 = arith.constant 0 : index
    %c0_43 = arith.constant 0 : index
    %159 = vector.load %arg7[%c0_42, %c0_43] : memref<8x128xf32, #tpu.memory_space<vmem>>, vector<8x128xf32>
    tpu.vector_store %arg7[%c0_42, %c0_43], %158 {strides = array<i32>} : memref<8x128xf32, #tpu.memory_space<vmem>>, vector<8x128xf32>,
    return
  }
  func.func @transform_0(%arg0: i32) -> (i32, i32) {
    %c0_i32 = arith.constant 0 : i32
    %c0_i32_0 = arith.constant 0 : i32
    %c0_i32_1 = arith.constant 0 : i32
    return %c0_i32, %c0_i32_0 : i32, i32
  }
  func.func @transform_1(%arg0: i32) -> (i32, i32) {
    %c0_i32 = arith.constant 0 : i32
    %c0_i32_0 = arith.constant 0 : i32
    %c0_i32_1 = arith.constant 0 : i32
    return %c0_i32, %c0_i32_0 : i32, i32
  }
  func.func @transform_2(%arg0: i32) -> (i32, i32) {
    %c0_i32 = arith.constant 0 : i32
    %c0_i32_0 = arith.constant 0 : i32
    return %arg0, %c0_i32 : i32, i32
  }
  func.func @transform_3(%arg0: i32) -> (i32, i32) {
    %c0_i32 = arith.constant 0 : i32
    %c0_i32_0 = arith.constant 0 : i32
    %c0_i32_1 = arith.constant 0 : i32
    return %c0_i32, %c0_i32_0 : i32, i32
  }
  func.func @transform_4(%arg0: i32) -> (i32, i32) {
    %c0_i32 = arith.constant 0 : i32
    %c0_i32_0 = arith.constant 0 : i32
    %c0_i32_1 = arith.constant 0 : i32
    return %c0_i32, %c0_i32_0 : i32, i32
  }
  func.func @transform_5(%arg0: i32) -> (i32, i32) {
    %c0_i32 = arith.constant 0 : i32
    %c0_i32_0 = arith.constant 0 : i32
    %c0_i32_1 = arith.constant 0 : i32
    return %c0_i32, %c0_i32_0 : i32, i32
  }
  func.func @transform_6(%arg0: i32) -> (i32, i32) {
    %c0_i32 = arith.constant 0 : i32
    %c0_i32_0 = arith.constant 0 : i32
    return %arg0, %c0_i32 : i32, i32
  }
}

</mosaic_0001>

<bundles_post_ra>
// kernel: tpu_custom_call.1
= control target key start
LH: loop header
LB: loop body
LE: loop exit
PB: predicated region body
PF: predicated region fallthrough
CT: control target
= control target key end

     0   :  { %11 = vsyncpa [#allocation3], 0  ;;  %s2678_s0 = inlined_call_operand.hbm [shape: f32[128,128], index: 0, kind: input, shape index: {}]   ;;  %s2679_s1 = inlined_call_operand.hbm [shape: f32[128,128], index: 1, kind: input, shape index: {}]   ;;  %s2680_s2 = inlined_call_operand.hbm [shape: f32[8,128], index: 2, kind: input, shape index: {}]   ;;  %s2681_s3 = inlined_call_operand.hbm [shape: f32[128,512], index: 3, kind: input, shape index: {}]   ;;  %s2682_s4 = inlined_call_operand.hbm [shape: f32[128,512], index: 4, kind: input, shape index: {}]   ;;  %s2683_s5 = inlined_call_operand.vmem [shape: f32[1,512], index: 5, kind: input, shape index: {}]   ;;  %s2684_s6 = inlined_call_operand.hbm [shape: f32[8,128], index: 6, kind: output, shape index: {}]  }
   0x1   :  { %12 = vsyncpa [#allocation6], 0 }
   0x2   :  { %13 = vsyncpa [#allocation9], 0 }
   0x3   :  { %14 = vsyncpa [#allocation4], 0  ;;  %s1949_s21 = smov [#allocation5]   ;;  %s1950_s23 = smov [#allocation8]  }
   0x4   :  { %s32_s22 = sshll.u32 %s1949_s21, 4  ;;  %s54_s24 = sshll.u32 %s1950_s23, 4  ;;  %s33_s22 = int_to_ptr.vmem [resolvable:$true] %s32_s22  ;;  %s55_s24 = int_to_ptr.vmem [resolvable:$true] %s54_s24 }
   0x5   :  { %s1829_s25 = scalar_lea.vmem %s33_s22, 2048  ;;  %p1834_p1 = scmp.lt.s32.totalorder %s33_s22, %s33_s22 }
   0x6   :  { %p1830_p0 = scmp.ne.s32.totalorder %s33_s22, %s1829_s25  ;;  %p1835_p2 = scmp.lt.s32.totalorder %s1829_s25, %s1829_s25 }
   0x8   :  { %p1836_p3 = por %p1835_p2, %p1834_p1 }
   0xa   :  { %p1837_p4 = pnand %p1836_p3, %p1830_p0 }
   0xc   :  { %1840 = shalt.err (!%p1837_p4)
}
   0xd   :  { %s1951_s26 = smov 128   ;;  %s1952_s27 = smov 8  }
   0xe   :  { %38 = dma.hbm_to_vmem [thread:$0]  %s2679_s1, 2048, %s33_s22, [#allocation6], %s1951_s26, %s1951_s26, %s1952_s27  }
   0xf   :  { %s1849_s30 = scalar_lea.vmem %s55_s24, 8192  ;;  %p1854_p6 = scmp.lt.s32.totalorder %s55_s24, %s55_s24 }
  0x10   :  { %p1850_p5 = scmp.ne.s32.totalorder %s55_s24, %s1849_s30  ;;  %p1855_p7 = scmp.lt.s32.totalorder %s1849_s30, %s1849_s30 }
  0x12   :  { %p1856_p8 = por %p1855_p7, %p1854_p6 }
  0x14   :  { %p1857_p9 = pnand %p1856_p8, %p1850_p5 }
  0x16   :  { %1860 = shalt.err (!%p1857_p9)
}
  0x17   :  { %s1953_s7 = smov 512   ;;  %s1954_s8 = smov 32  }
  0x18   :  { %60 = dma.hbm_to_vmem [thread:$0]  %s2681_s3, 8192, %s55_s24, [#allocation9], %s1953_s7, %s1953_s7, %s1954_s8  }
  0x19   :  { %s1955_s11 = smov [#allocation2]   ;;  %s1956_s13 = smov [#allocation7]  }
  0x1a   :  { %s20_s12 = sshll.u32 %s1955_s11, 4  ;;  %s45_s1 = sshll.u32 %s1956_s13, 4  ;;  %s21_s12 = int_to_ptr.vmem [resolvable:$true] %s20_s12  ;;  %s46_s1 = int_to_ptr.vmem [resolvable:$true] %s45_s1 }
  0x1b   :  { %s1869_s14 = scalar_lea.vmem %s21_s12, 2048  ;;  %p1874_p11 = scmp.lt.s32.totalorder %s21_s12, %s21_s12 }
  0x1c   :  { %p1870_p10 = scmp.ne.s32.totalorder %s21_s12, %s1869_s14  ;;  %p1875_p12 = scmp.lt.s32.totalorder %s1869_s14, %s1869_s14 }
  0x1e   :  { %p1876_p13 = por %p1875_p12, %p1874_p11 }
  0x20   :  { %p1877_p0 = pnand %p1876_p13, %p1870_p10 }
  0x22   :  { %1880 = shalt.err (!%p1877_p0)
}
  0x23   :  { %26 = dma.hbm_to_vmem [thread:$0]  %s2678_s0, 2048, %s21_s12, [#allocation3], %s1951_s26, %s1951_s26, %s1952_s27  }
  0x24   :  { %s1889_s17 = scalar_lea.vmem %s46_s1, 128  ;;  %p1894_p2 = scmp.lt.s32.totalorder %s46_s1, %s46_s1 }
  0x25   :  { %p1890_p1 = scmp.ne.s32.totalorder %s46_s1, %s1889_s17  ;;  %p1895_p3 = scmp.lt.s32.totalorder %s1889_s17, %s1889_s17 }
  0x27   :  { %p1896_p4 = por %p1895_p3, %p1894_p2 }
  0x29   :  { %p1897_p5 = pnand %p1896_p4, %p1890_p1 }
  0x2b   :  { %1900 = shalt.err (!%p1897_p5)
}
  0x2c   :  { %48 = dma.hbm_to_vmem [thread:$0]  %s2680_s2, 128, %s46_s1, [#allocation6]  }
  0x2d   :  { %s1957_s19 = smov [#allocation10]  }
  0x2e   :  { %s66_s20 = sshll.u32 %s1957_s19, 4  ;;  %s67_s20 = int_to_ptr.vmem [resolvable:$true] %s66_s20 }
  0x2f   :  { %s1909_s21 = scalar_lea.vmem %s67_s20, 8192  ;;  %p1914_p7 = scmp.lt.s32.totalorder %s67_s20, %s67_s20 }
  0x30   :  { %p1910_p6 = scmp.ne.s32.totalorder %s67_s20, %s1909_s21  ;;  %p1915_p8 = scmp.lt.s32.totalorder %s1909_s21, %s1909_s21 }
  0x32   :  { %p1916_p9 = por %p1915_p8, %p1914_p7 }
  0x34   :  { %p1917_p10 = pnand %p1916_p9, %p1910_p6 }
  0x36   :  { %1920 = shalt.err (!%p1917_p10)
}
  0x37   :  { %72 = dma.hbm_to_vmem [thread:$0]  %s2682_s4, 8192, %s67_s20, [#allocation9], %s1953_s7, %s1953_s7, %s1954_s8  }
  0x38   :  { %1941 = dma.done.wait [#allocation3], 2048  }
  0x39   :  { %1942 = vsyncadd [#allocation3], 4294965248 }
  0x3a   :  { %1943 = dma.done.wait [#allocation6], 2176  }
  0x3b   :  { %1944 = vsyncadd [#allocation6], 4294965120 }
  0x3c   :  { %1945 = dma.done.wait [#allocation9], 16384  }
  0x3d   :  { %1946 = vsyncadd [#allocation9], 4294950912  ;;  %v2686_v0 = vmov 0.0   ;;  %v184_v1 = vld [vmem:[#allocation8 + $0x1e8] sm:$0xff]  ;;  %v183_v2 = vld [vmem:[#allocation8 + $0x1e0] sm:$0xff]  ;;  %vm1959_vm0 = vmmov 0   ;;  %v2685_v50 = vlaneseq }
  0x3e   :  { %337 = vmatprep.mubr.f32.mxu0 %v2686_v0  ;;  %408 = vmatprep.mubr.f32.mxu1 %v2686_v0  ;;  %v180_v3 = vld [vmem:[#allocation8 + $0x1c8] sm:$0xff]  ;;  %v179_v4 = vld [vmem:[#allocation8 + $0x1c0] sm:$0xff]  ;;  %v2020_v33 = vld [vmem:[#allocation7] sm:$0xff]  ;;  %v1960_v54 = vmov -1e+30  }
  0x3f   :  { %273 = vmatprep.subr.mxu0 %v184_v1  ;;  %v176_v5 = vld [vmem:[#allocation8 + $0x1a8] sm:$0xff]  ;;  %v175_v6 = vld [vmem:[#allocation8 + $0x1a0] sm:$0xff]  ;;  %v2022_v34 = vld [vmem:[#allocation5 + $0x78] sm:$0xff]  ;;  %v416_v51 = vand.u32 127, %v2685_v50 }
  0x40   :  { %274 = vmatpush1.msra.mxu0 %v183_v2  ;;  %v172_v7 = vld [vmem:[#allocation8 + $0x188] sm:$0xff]  ;;  %v171_v8 = vld [vmem:[#allocation8 + $0x180] sm:$0xff]  ;;  %v2036_v37 = vld [vmem:[#allocation5 + $0x60] sm:$0xff] }
  0x41   :  { %275 = vmatprep.subr.mxu0 %v180_v3  ;;  %v168_v9 = vld [vmem:[#allocation8 + $0x168] sm:$0xff]  ;;  %v167_v10 = vld [vmem:[#allocation8 + $0x160] sm:$0xff]  ;;  %v2040_v38 = vld [vmem:[#allocation5 + $0x58] sm:$0xff]  ;;  %vm417_vm1 = vcmp.lt.s32.totalorder %v416_v51, 16 }
  0x42   :  { %276 = vmatpush1.msra.mxu0 %v179_v4  ;;  %v164_v11 = vld [vmem:[#allocation8 + $0x148] sm:$0xff]  ;;  %v163_v12 = vld [vmem:[#allocation8 + $0x140] sm:$0xff]  ;;  %v2052_v41 = vld [vmem:[#allocation5 + $0x40] sm:$0xff]  ;;  %v2096_v55 = vsel %vm417_vm1, 0.0, %v1960_v54 }
  0x43   :  { %277 = vmatprep.subr.mxu0 %v176_v5  ;;  %v160_v13 = vld [vmem:[#allocation8 + $0x128] sm:$0xff]  ;;  %v159_v14 = vld [vmem:[#allocation8 + $0x120] sm:$0xff]  ;;  %v2056_v42 = vld [vmem:[#allocation5 + $0x38] sm:$0xff]  ;;  %2775 = vst [vmem:[#allocation16_spill] sm:$0xff] %v2096_v55 }
  0x44   :  { %278 = vmatpush1.msra.mxu0 %v175_v6  ;;  %v156_v15 = vld [vmem:[#allocation8 + $0x108] sm:$0xff]  ;;  %v155_v16 = vld [vmem:[#allocation8 + $0x100] sm:$0xff]  ;;  %v2068_v45 = vld [vmem:[#allocation5 + $0x20] sm:$0xff] }
  0x45   :  { %279 = vmatprep.subr.mxu0 %v172_v7  ;;  %v152_v17 = vld [vmem:[#allocation8 + $0xe8] sm:$0xff]  ;;  %v151_v18 = vld [vmem:[#allocation8 + $0xe0] sm:$0xff]  ;;  %v2072_v46 = vld [vmem:[#allocation5 + $0x18] sm:$0xff] }
  0x46   :  { %280 = vmatpush1.msra.mxu0 %v171_v8  ;;  %v148_v19 = vld [vmem:[#allocation8 + $0xc8] sm:$0xff]  ;;  %v147_v20 = vld [vmem:[#allocation8 + $0xc0] sm:$0xff]  ;;  %v2084_v49 = vld [vmem:[#allocation5] sm:$0xff] }
  0x47   :  { %281 = vmatprep.subr.mxu0 %v168_v9  ;;  %v144_v21 = vld [vmem:[#allocation8 + $0xa8] sm:$0xff]  ;;  %v143_v22 = vld [vmem:[#allocation8 + $0xa0] sm:$0xff]  ;;  %v186_v59 = vld [vmem:[#allocation8 + $0x1f8] sm:$0xff] }
  0x48   :  { %282 = vmatpush1.msra.mxu0 %v167_v10  ;;  %v140_v23 = vld [vmem:[#allocation8 + $0x88] sm:$0xff]  ;;  %v139_v24 = vld [vmem:[#allocation8 + $0x80] sm:$0xff]  ;;  %v185_v60 = vld [vmem:[#allocation8 + $0x1f0] sm:$0xff]  ;;  %344 = vmatprep.subr.mxu1 %v186_v59 }
  0x49   :  { %283 = vmatprep.subr.mxu0 %v164_v11  ;;  %v136_v25 = vld [vmem:[#allocation8 + $0x68] sm:$0xff]  ;;  %v135_v26 = vld [vmem:[#allocation8 + $0x60] sm:$0xff]  ;;  %v182_v61 = vld [vmem:[#allocation8 + $0x1d8] sm:$0xff]  ;;  %345 = vmatpush1.msra.mxu1 %v185_v60 }
  0x4a   :  { %284 = vmatpush1.msra.mxu0 %v163_v12  ;;  %v132_v27 = vld [vmem:[#allocation8 + $0x48] sm:$0xff]  ;;  %v131_v28 = vld [vmem:[#allocation8 + $0x40] sm:$0xff]  ;;  %v181_v62 = vld [vmem:[#allocation8 + $0x1d0] sm:$0xff]  ;;  %346 = vmatprep.subr.mxu1 %v182_v61 }
  0x4b   :  { %285 = vmatprep.subr.mxu0 %v160_v13  ;;  %v128_v29 = vld [vmem:[#allocation8 + $0x28] sm:$0xff]  ;;  %v127_v30 = vld [vmem:[#allocation8 + $0x20] sm:$0xff]  ;;  %v178_v63 = vld [vmem:[#allocation8 + $0x1b8] sm:$0xff]  ;;  %347 = vmatpush1.msra.mxu1 %v181_v62 }
  0x4c   :  { %286 = vmatpush1.msra.mxu0 %v159_v14  ;;  %v124_v31 = vld [vmem:[#allocation8 + $0x8] sm:$0xff]  ;;  %v123_v32 = vld [vmem:[#allocation8] sm:$0xff]  ;;  %v177_v1 = vld [vmem:[#allocation8 + $0x1b0] sm:$0xff]  ;;  %348 = vmatprep.subr.mxu1 %v178_v63 }
  0x4d   :  { %287 = vmatprep.subr.mxu0 %v156_v15  ;;  %v2026_v35 = vld [vmem:[#allocation5 + $0x70] sm:$0xff]  ;;  %v2032_v36 = vld [vmem:[#allocation5 + $0x68] sm:$0xff]  ;;  %v174_v2 = vld [vmem:[#allocation8 + $0x198] sm:$0xff]  ;;  %349 = vmatpush1.msra.mxu1 %v177_v1 }
  0x4e   :  { %288 = vmatpush1.msra.mxu0 %v155_v16  ;;  %v2044_v39 = vld [vmem:[#allocation5 + $0x50] sm:$0xff]  ;;  %v2048_v40 = vld [vmem:[#allocation5 + $0x48] sm:$0xff]  ;;  %v173_v3 = vld [vmem:[#allocation8 + $0x190] sm:$0xff]  ;;  %350 = vmatprep.subr.mxu1 %v174_v2 }
  0x4f   :  { %289 = vmatprep.subr.mxu0 %v152_v17  ;;  %v2060_v43 = vld [vmem:[#allocation5 + $0x30] sm:$0xff]  ;;  %v2064_v44 = vld [vmem:[#allocation5 + $0x28] sm:$0xff]  ;;  %v170_v4 = vld [vmem:[#allocation8 + $0x178] sm:$0xff]  ;;  %351 = vmatpush1.msra.mxu1 %v173_v3 }
  0x50   :  { %290 = vmatpush1.msra.mxu0 %v151_v18  ;;  %v2076_v47 = vld [vmem:[#allocation5 + $0x10] sm:$0xff]  ;;  %v2080_v48 = vld [vmem:[#allocation5 + $0x8] sm:$0xff]  ;;  %v169_v5 = vld [vmem:[#allocation8 + $0x170] sm:$0xff]  ;;  %352 = vmatprep.subr.mxu1 %v170_v4 }
  0x51   :  { %291 = vmatprep.subr.mxu0 %v148_v19  ;;  %v166_v6 = vld [vmem:[#allocation8 + $0x158] sm:$0xff]  ;;  %v165_v7 = vld [vmem:[#allocation8 + $0x150] sm:$0xff]  ;;  %353 = vmatpush1.msra.mxu1 %v169_v5  ;;  %v2130_v59 = vld [vmem:[#allocation2 + $0x50] sm:$0xff] }
  0x52   :  { %292 = vmatpush1.msra.mxu0 %v147_v20  ;;  %v162_v8 = vld [vmem:[#allocation8 + $0x138] sm:$0xff]  ;;  %354 = vmatprep.subr.mxu1 %v166_v6  ;;  %v161_v9 = vld [vmem:[#allocation8 + $0x130] sm:$0xff]  ;;  %v2134_v60 = vld [vmem:[#allocation2 + $0x48] sm:$0xff] }
  0x53   :  { %293 = vmatprep.subr.mxu0 %v144_v21  ;;  %355 = vmatpush1.msra.mxu1 %v165_v7  ;;  %v158_v10 = vld [vmem:[#allocation8 + $0x118] sm:$0xff]  ;;  %v157_v11 = vld [vmem:[#allocation8 + $0x110] sm:$0xff]  ;;  %v2146_v62 = vld [vmem:[#allocation2 + $0x30] sm:$0xff] }
  0x54   :  { %294 = vmatpush1.msra.mxu0 %v143_v22  ;;  %356 = vmatprep.subr.mxu1 %v162_v8  ;;  %v154_v12 = vld [vmem:[#allocation8 + $0xf8] sm:$0xff]  ;;  %v153_v13 = vld [vmem:[#allocation8 + $0xf0] sm:$0xff]  ;;  %v2150_v63 = vld [vmem:[#allocation2 + $0x28] sm:$0xff] }
  0x55   :  { %295 = vmatprep.subr.mxu0 %v140_v23  ;;  %357 = vmatpush1.msra.mxu1 %v161_v9  ;;  %v150_v14 = vld [vmem:[#allocation8 + $0xd8] sm:$0xff]  ;;  %v149_v15 = vld [vmem:[#allocation8 + $0xd0] sm:$0xff]  ;;  %v2162_v3 = vld [vmem:[#allocation2 + $0x10] sm:$0xff] }
  0x56   :  { %296 = vmatpush1.msra.mxu0 %v139_v24  ;;  %358 = vmatprep.subr.mxu1 %v158_v10  ;;  %v146_v16 = vld [vmem:[#allocation8 + $0xb8] sm:$0xff]  ;;  %v145_v17 = vld [vmem:[#allocation8 + $0xb0] sm:$0xff]  ;;  %v2166_v4 = vld [vmem:[#allocation2 + $0x8] sm:$0xff] }
  0x57   :  { %297 = vmatprep.subr.mxu0 %v136_v25  ;;  %359 = vmatpush1.msra.mxu1 %v157_v11  ;;  %v142_v18 = vld [vmem:[#allocation8 + $0x98] sm:$0xff]  ;;  %v141_v19 = vld [vmem:[#allocation8 + $0x90] sm:$0xff]  ;;  %v2173_v6 = vld [vmem:[#allocation10 + $0x1e8] sm:$0xff] }
  0x58   :  { %298 = vmatpush1.msra.mxu0 %v135_v26  ;;  %360 = vmatprep.subr.mxu1 %v154_v12  ;;  %v138_v20 = vld [vmem:[#allocation8 + $0x78] sm:$0xff]  ;;  %v137_v21 = vld [vmem:[#allocation8 + $0x70] sm:$0xff]  ;;  %v2177_v8 = vld [vmem:[#allocation10 + $0x1e0] sm:$0xff] }
  0x59   :  { %299 = vmatprep.subr.mxu0 %v132_v27  ;;  %361 = vmatpush1.msra.mxu1 %v153_v13  ;;  %v134_v22 = vld [vmem:[#allocation8 + $0x58] sm:$0xff]  ;;  %v133_v23 = vld [vmem:[#allocation8 + $0x50] sm:$0xff]  ;;  %v2181_v9 = vld [vmem:[#allocation10 + $0x1c8] sm:$0xff] }
  0x5a   :  { %300 = vmatpush1.msra.mxu0 %v131_v28  ;;  %362 = vmatprep.subr.mxu1 %v150_v14  ;;  %v130_v24 = vld [vmem:[#allocation8 + $0x38] sm:$0xff]  ;;  %v129_v25 = vld [vmem:[#allocation8 + $0x30] sm:$0xff]  ;;  %v2184_v10 = vld [vmem:[#allocation10 + $0x1c0] sm:$0xff] }
  0x5b   :  { %301 = vmatprep.subr.mxu0 %v128_v29  ;;  %363 = vmatpush1.msra.mxu1 %v149_v15  ;;  %v126_v26 = vld [vmem:[#allocation8 + $0x18] sm:$0xff]  ;;  %v125_v27 = vld [vmem:[#allocation8 + $0x10] sm:$0xff]  ;;  %v2106_v29 = vld [vmem:[#allocation2 + $0x70] sm:$0xff] }
  0x5c   :  { %302 = vmatpush1.msra.mxu0 %v127_v30  ;;  %364 = vmatprep.subr.mxu1 %v146_v16  ;;  %v2102_v28 = vld [vmem:[#allocation2 + $0x78] sm:$0xff]  ;;  %v2112_v30 = vld [vmem:[#allocation2 + $0x68] sm:$0xff]  ;;  %v2154_v1 = vld [vmem:[#allocation2 + $0x20] sm:$0xff] }
  0x5d   :  { %303 = vmatprep.subr.mxu0 %v124_v31  ;;  %365 = vmatpush1.msra.mxu1 %v145_v17  ;;  %v2116_v31 = vld [vmem:[#allocation2 + $0x60] sm:$0xff]  ;;  %v2142_v61 = vld [vmem:[#allocation2 + $0x38] sm:$0xff]  ;;  %v2187_v11 = vld [vmem:[#allocation10 + $0x1a8] sm:$0xff] }
  0x5e   :  { %304 = vmatpush1.msra.mxu0 %v123_v32  ;;  %366 = vmatprep.subr.mxu1 %v142_v18  ;;  %v2158_v2 = vld [vmem:[#allocation2 + $0x18] sm:$0xff]  ;;  %v2170_v5 = vld [vmem:[#allocation2] sm:$0xff]  ;;  %v2190_v12 = vld [vmem:[#allocation10 + $0x1a0] sm:$0xff] }
  0x5f   :  { %338 = vmatmul.mubr.f32.vlgmr.msra.gmra.mxu0 %v2020_v33  ;;  %1521 = vmatprep.subr.mxu0 %v2686_v0  ;;  %v2175_v7 = vld [vmem:[#allocation10 + $0x1f8] sm:$0xff]  ;;  %v2193_v13 = vld [vmem:[#allocation10 + $0x188] sm:$0xff]  ;;  %v2196_v14 = vld [vmem:[#allocation10 + $0x180] sm:$0xff] }
  0x60   :  { %1522 = vmatpush3.msra.mxu0 %v2022_v34  ;;  %1553 = vmatprep.mubr.msk.f32.mxu0 %vm1959_vm0, %v2686_v0  ;;  %v2199_v15 = vld [vmem:[#allocation10 + $0x168] sm:$0xff]  ;;  %v2202_v16 = vld [vmem:[#allocation10 + $0x160] sm:$0xff] }
  0x61   :  { %1523 = vmatprep.subr.mxu0 %v2686_v0  ;;  %367 = vmatpush1.msra.mxu1 %v141_v19  ;;  %v2205_v17 = vld [vmem:[#allocation10 + $0x148] sm:$0xff]  ;;  %v2208_v18 = vld [vmem:[#allocation10 + $0x140] sm:$0xff] }
  0x62   :  { %1524 = vmatpush3.msra.mxu0 %v2026_v35  ;;  %368 = vmatprep.subr.mxu1 %v138_v20  ;;  %v2211_v19 = vld [vmem:[#allocation10 + $0x128] sm:$0xff]  ;;  %v2214_v20 = vld [vmem:[#allocation10 + $0x120] sm:$0xff] }
  0x63   :  { %1525 = vmatprep.subr.mxu0 %v2686_v0  ;;  %369 = vmatpush1.msra.mxu1 %v137_v21  ;;  %v2217_v21 = vld [vmem:[#allocation10 + $0x108] sm:$0xff] }
  0x64   :  { %1526 = vmatpush3.msra.mxu0 %v2032_v36  ;;  %370 = vmatprep.subr.mxu1 %v134_v22  ;;  %v2220_v22 = vld [vmem:[#allocation10 + $0x100] sm:$0xff]  ;;  %v2247_v50 = vld [vmem:[#allocation10 + $0x68] sm:$0xff] }
  0x65   :  { %1527 = vmatprep.subr.mxu0 %v2686_v0  ;;  %371 = vmatpush1.msra.mxu1 %v133_v23  ;;  %v2223_v23 = vld [vmem:[#allocation10 + $0xe8] sm:$0xff]  ;;  %2784 = vst [vmem:[#allocation25_spill] sm:$0xff] %v2247_v50 }
  0x66   :  { %1528 = vmatpush3.msra.mxu0 %v2036_v37  ;;  %372 = vmatprep.subr.mxu1 %v130_v24  ;;  %2776 = vst [vmem:[#allocation17_spill] sm:$0xff] %v2223_v23  ;;  %v2226_v24 = vld [vmem:[#allocation10 + $0xe0] sm:$0xff] }
  0x67   :  { %1529 = vmatprep.subr.mxu0 %v2686_v0  ;;  %373 = vmatpush1.msra.mxu1 %v129_v25  ;;  %2777 = vst [vmem:[#allocation18_spill] sm:$0xff] %v2226_v24  ;;  %v2229_v25 = vld [vmem:[#allocation10 + $0xc8] sm:$0xff] }
  0x68   :  { %1530 = vmatpush3.msra.mxu0 %v2040_v38  ;;  %374 = vmatprep.subr.mxu1 %v126_v26  ;;  %2778 = vst [vmem:[#allocation19_spill] sm:$0xff] %v2229_v25  ;;  %v2232_v26 = vld [vmem:[#allocation10 + $0xc0] sm:$0xff] }
  0x69   :  { %1531 = vmatprep.subr.mxu0 %v2686_v0  ;;  %375 = vmatpush1.msra.mxu1 %v125_v27  ;;  %2779 = vst [vmem:[#allocation20_spill] sm:$0xff] %v2232_v26  ;;  %v2235_v27 = vld [vmem:[#allocation10 + $0xa8] sm:$0xff] }
  0x6a   :  { %1532 = vmatpush3.msra.mxu0 %v2044_v39  ;;  %409 = vmatmul.mubr.f32.vlgmr.msra.gmra.mxu1 %v2020_v33  ;;  %2780 = vst [vmem:[#allocation21_spill] sm:$0xff] %v2235_v27 }
  0x6b   :  { %1533 = vmatprep.subr.mxu0 %v2686_v0  ;;  %1556 = vmatprep.subr.mxu1 %v2686_v0 }
  0x6c   :  { %1534 = vmatpush3.msra.mxu0 %v2048_v40  ;;  %1557 = vmatpush3.msra.mxu1 %v2102_v28 }
  0x6d   :  { %1535 = vmatprep.subr.mxu0 %v2686_v0  ;;  %1588 = vmatprep.mubr.msk.f32.mxu1 %vm1959_vm0, %v2686_v0 }
  0x6e   :  { %1536 = vmatpush3.msra.mxu0 %v2052_v41  ;;  %1558 = vmatprep.subr.mxu1 %v2686_v0 }
  0x6f   :  { %1537 = vmatprep.subr.mxu0 %v2686_v0  ;;  %1559 = vmatpush3.msra.mxu1 %v2106_v29 }
  0x70   :  { %1538 = vmatpush3.msra.mxu0 %v2056_v42  ;;  %1560 = vmatprep.subr.mxu1 %v2686_v0 }
  0x71   :  { %1539 = vmatprep.subr.mxu0 %v2686_v0  ;;  %1561 = vmatpush3.msra.mxu1 %v2112_v30 }
  0x72   :  { %1540 = vmatpush3.msra.mxu0 %v2060_v43  ;;  %1562 = vmatprep.subr.mxu1 %v2686_v0 }
  0x73   :  { %1541 = vmatprep.subr.mxu0 %v2686_v0  ;;  %1563 = vmatpush3.msra.mxu1 %v2116_v31 }
  0x74   :  { %1542 = vmatpush3.msra.mxu0 %v2064_v44  ;;  %1564 = vmatprep.subr.mxu1 %v2686_v0 }
  0x75   :  { %1543 = vmatprep.subr.mxu0 %v2686_v0 }
  0x76   :  { %1544 = vmatpush3.msra.mxu0 %v2068_v45 }
  0x77   :  { %1545 = vmatprep.subr.mxu0 %v2686_v0 }
  0x78   :  { %1546 = vmatpush3.msra.mxu0 %v2072_v46 }
  0x79   :  { %1547 = vmatprep.subr.mxu0 %v2686_v0 }
  0x7a   :  { %1548 = vmatpush3.msra.mxu0 %v2076_v47 }
  0x7b   :  { %1549 = vmatprep.subr.mxu0 %v2686_v0 }
  0x7c   :  { %1550 = vmatpush3.msra.mxu0 %v2080_v48 }
  0x7d   :  { %1551 = vmatprep.subr.mxu0 %v2686_v0 }
  0x7e   :  { %1552 = vmatpush3.msra.mxu0 %v2084_v49 }
  0x7f   :  { %1554 = vmatmul.mubr.f32.vlgmr.msra.gmra.mxu0 %v2020_v33  ;;  %573 = vmatprep.subr.mxu0 %v2173_v6 }
  0x80   :  { %637 = vmatprep.mubr.f32.mxu0 %v2686_v0  ;;  %574 = vmatpush1.msra.mxu0 %v2177_v8 }
  0x81   :  { %575 = vmatprep.subr.mxu0 %v2181_v9 }
  0x82   :  { %576 = vmatpush1.msra.mxu0 %v2184_v10 }
  0x83   :  { %577 = vmatprep.subr.mxu0 %v2187_v11 }
  0x84   :  { %578 = vmatpush1.msra.mxu0 %v2190_v12 }
  0x85   :  { %579 = vmatprep.subr.mxu0 %v2193_v13 }
  0x86   :  { %580 = vmatpush1.msra.mxu0 %v2196_v14 }
  0x87   :  { %581 = vmatprep.subr.mxu0 %v2199_v15 }
  0x88   :  { %582 = vmatpush1.msra.mxu0 %v2202_v16 }
  0x89   :  { %583 = vmatprep.subr.mxu0 %v2205_v17 }
  0x8a   :  { %584 = vmatpush1.msra.mxu0 %v2208_v18 }
  0x8b   :  { %585 = vmatprep.subr.mxu0 %v2211_v19 }
  0x8c   :  { %586 = vmatpush1.msra.mxu0 %v2214_v20 }
  0x8d   :  { %587 = vmatprep.subr.mxu0 %v2217_v21 }
  0x8e   :  { %588 = vmatpush1.msra.mxu0 %v2220_v22 }
  0x8f   :  { %589 = vmatprep.subr.mxu0 %v2223_v23  ;;  %v2264_v23 = vld [vmem:[#allocation10 + $0x1f0] sm:$0xff] }
  0x90   :  { %590 = vmatpush1.msra.mxu0 %v2226_v24 }
  0x91   :  { %591 = vmatprep.subr.mxu0 %v2229_v25 }
  0x92   :  { %592 = vmatpush1.msra.mxu0 %v2232_v26 }
  0x93   :  { %593 = vmatprep.subr.mxu0 %v2235_v27  ;;  %v2256_v27 = vld [vmem:[#allocation10 + $0x40] sm:$0xff] }
  0x94   :  { %2787 = vst [vmem:[#allocation28_spill] sm:$0xff] %v2256_v27 }
 0x11f   :  { %v2092_v52 = vpop.f32.mrf.mxu0 }
 0x121   :  { %v2094_v53 = vpop.f32.mrf.mxu0 }
 0x13f   :  { %v486_v56 = vpop.f32.mrf.mxu0 }
 0x140   :  { %v2099_v57 = vadd.f32 %v486_v56, %v2096_v55  ;;  %v2253_v55 = vld [vmem:[#allocation10 + $0x48] sm:$0xff] }
 0x141   :  { %v1555_v58 = vpop.f32.mrf.mxu0  ;;  %2786 = vst [vmem:[#allocation27_spill] sm:$0xff] %v2253_v55 }
 0x142   :  { %490 = vmax.xlane.f32.xlu0 %v2099_v57  ;;  %v2126_v58 = vld [vmem:[#allocation2 + $0x58] sm:$0xff] }
 0x143   :  { %1565 = vmatpush3.msra.mxu1 %v2126_v58 }
 0x144   :  { %1566 = vmatprep.subr.mxu1 %v2686_v0 }
 0x145   :  { %1567 = vmatpush3.msra.mxu1 %v2130_v59 }
 0x146   :  { %1568 = vmatprep.subr.mxu1 %v2686_v0 }
 0x147   :  { %1569 = vmatpush3.msra.mxu1 %v2134_v60 }
 0x148   :  { %1570 = vmatprep.subr.mxu1 %v2686_v0 }
 0x1cb   :  { %v491_v32 = vpop.xlane.xlu0 %490 }
 0x1cc   :  { %v492_v51 = vsub.f32 %v2099_v57, %v491_v32  ;;  %v2138_v57 = vld [vmem:[#allocation2 + $0x40] sm:$0xff]  ;;  %v2238_v32 = vld [vmem:[#allocation10 + $0xa0] sm:$0xff] }
 0x1cd   :  { %1571 = vmatpush3.msra.mxu1 %v2138_v57  ;;  %2781 = vst [vmem:[#allocation22_spill] sm:$0xff] %v2238_v32  ;;  %594 = vmatpush1.msra.mxu0 %v2238_v32  ;;  %v2259_v32 = vld [vmem:[#allocation10 + $0x28] sm:$0xff] }
 0x1ce   :  { %v493_v54 = vmul.f32 1.442695, %v492_v51  ;;  %1572 = vmatprep.subr.mxu1 %v2686_v0  ;;  %v2241_v51 = vld [vmem:[#allocation10 + $0x88] sm:$0xff]  ;;  %2788 = vst [vmem:[#allocation29_spill] sm:$0xff] %v2259_v32 }
 0x1cf   :  { %1573 = vmatpush3.msra.mxu1 %v2142_v61  ;;  %2782 = vst [vmem:[#allocation23_spill] sm:$0xff] %v2241_v51  ;;  %595 = vmatprep.subr.mxu0 %v2241_v51 }
 0x1d0   :  { %1744 = vpow2.f32 %v493_v54  ;;  %1574 = vmatprep.subr.mxu1 %v2686_v0  ;;  %v2244_v54 = vld [vmem:[#allocation10 + $0x80] sm:$0xff] }
 0x1d1   :  { %1575 = vmatpush3.msra.mxu1 %v2146_v62  ;;  %2783 = vst [vmem:[#allocation24_spill] sm:$0xff] %v2244_v54  ;;  %596 = vmatpush1.msra.mxu0 %v2244_v54 }
 0x1d2   :  { %1576 = vmatprep.subr.mxu1 %v2686_v0  ;;  %597 = vmatprep.subr.mxu0 %v2247_v50 }
 0x1d3   :  { %1577 = vmatpush3.msra.mxu1 %v2150_v63 }
 0x1d4   :  { %1578 = vmatprep.subr.mxu1 %v2686_v0 }
 0x1d5   :  { %1579 = vmatpush3.msra.mxu1 %v2154_v1 }
 0x1d6   :  { %1580 = vmatprep.subr.mxu1 %v2686_v0 }
 0x1d7   :  { %1581 = vmatpush3.msra.mxu1 %v2158_v2 }
 0x1d8   :  { %1582 = vmatprep.subr.mxu1 %v2686_v0 }
 0x1d9   :  { %1583 = vmatpush3.msra.mxu1 %v2162_v3 }
 0x1da   :  { %1584 = vmatprep.subr.mxu1 %v2686_v0 }
 0x1db   :  { %1585 = vmatpush3.msra.mxu1 %v2166_v4 }
 0x1dc   :  { %1586 = vmatprep.subr.mxu1 %v2686_v0  ;;  %v2250_v0 = vld [vmem:[#allocation10 + $0x60] sm:$0xff] }
 0x1dd   :  { %v2123_v56 = vpop.eup %1744  ;;  %1587 = vmatpush3.msra.mxu1 %v2170_v5  ;;  %2785 = vst [vmem:[#allocation26_spill] sm:$0xff] %v2250_v0  ;;  %598 = vmatpush1.msra.mxu0 %v2250_v0  ;;  %v2266_v0 = vld [vmem:[#allocation10 + $0x1d8] sm:$0xff] }
 0x1de   :  { %495 = vadd.xlane.f32.xlu0 %v2123_v56  ;;  %644 = vmatprep.subr.mxu1 %v2175_v7 }
 0x1df   :  { %599 = vmatprep.subr.mxu0 %v2253_v55  ;;  %v2268_v55 = vld [vmem:[#allocation10 + $0x1d0] sm:$0xff] }
 0x1e0   :  { %600 = vmatpush1.msra.mxu0 %v2256_v27  ;;  %2789 = vst [vmem:[#allocation30_spill] sm:$0xff] %v2268_v55  ;;  %v2271_v27 = vld [vmem:[#allocation10 + $0x1b8] sm:$0xff] }
 0x1e1   :  { %601 = vmatprep.subr.mxu0 %v2259_v32  ;;  %2790 = vst [vmem:[#allocation31_spill] sm:$0xff] %v2271_v27  ;;  %v2791_v32 = vmov 0.0  }
 0x267   :  { %v496_v51 = vpop.xlane.xlu0 %495 }
 0x268   :  { %1746 = vrcp.f32 %v496_v51 }
 0x275   :  { %v1747_v54 = vpop.eup %1746 }
 0x276   :  { %v498_v26 = vmul.f32 %v1747_v54, %v496_v51  ;;  %v2275_v51 = vld [vmem:[#allocation10 + $0x1b0] sm:$0xff] }
 0x277   :  { %2792 = vst [vmem:[#allocation32_spill] sm:$0xff] %v2275_v51 }
 0x278   :  { %v499_v25 = vsub.f32 2.0, %v498_v26  ;;  %v2290_v26 = vld [vmem:[#allocation10 + $0x158] sm:$0xff] }
 0x279   :  { %2797 = vst [vmem:[#allocation37_spill] sm:$0xff] %v2290_v26 }
 0x27a   :  { %v500_v50 = vmul.f32 %v1747_v54, %v499_v25  ;;  %v2287_v25 = vld [vmem:[#allocation10 + $0x170] sm:$0xff] }
 0x27b   :  { %2796 = vst [vmem:[#allocation36_spill] sm:$0xff] %v2287_v25  ;;  %v2293_v54 = vld [vmem:[#allocation10 + $0x150] sm:$0xff] }
 0x27c   :  { %v501_v24 = vmul.f32 %v2123_v56, %v500_v50  ;;  %v2278_v50 = vld [vmem:[#allocation10 + $0x198] sm:$0xff]  ;;  %v2281_v56 = vld [vmem:[#allocation10 + $0x190] sm:$0xff]  ;;  %2798 = vst [vmem:[#allocation38_spill] sm:$0xff] %v2293_v54 }
 0x27d   :  { %2793 = vst [vmem:[#allocation33_spill] sm:$0xff] %v2278_v50  ;;  %2794 = vst [vmem:[#allocation34_spill] sm:$0xff] %v2281_v56 }
 0x27e   :  { %1589 = vmatmul.mubr.f32.vlgmr.msra.gmra.mxu1 %v501_v24  ;;  %v2284_v24 = vld [vmem:[#allocation10 + $0x178] sm:$0xff] }
 0x27f   :  { %645 = vmatpush1.msra.mxu1 %v2264_v23  ;;  %708 = vmatprep.mubr.f32.mxu1 %v2791_v32  ;;  %2795 = vst [vmem:[#allocation35_spill] sm:$0xff] %v2284_v24 }
 0x280   :  { %646 = vmatprep.subr.mxu1 %v2266_v0 }
 0x281   :  { %647 = vmatpush1.msra.mxu1 %v2268_v55 }
 0x282   :  { %648 = vmatprep.subr.mxu1 %v2271_v27  ;;  %v2296_v27 = vld [vmem:[#allocation10 + $0x138] sm:$0xff] }
 0x283   :  { %649 = vmatpush1.msra.mxu1 %v2275_v51  ;;  %2799 = vst [vmem:[#allocation39_spill] sm:$0xff] %v2296_v27  ;;  %v2299_v51 = vld [vmem:[#allocation10 + $0x130] sm:$0xff] }
 0x284   :  { %650 = vmatprep.subr.mxu1 %v2278_v50  ;;  %2800 = vst [vmem:[#allocation40_spill] sm:$0xff] %v2299_v51  ;;  %v2302_v50 = vld [vmem:[#allocation10 + $0x118] sm:$0xff] }
 0x285   :  { %651 = vmatpush1.msra.mxu1 %v2281_v56  ;;  %2801 = vst [vmem:[#allocation41_spill] sm:$0xff] %v2302_v50  ;;  %v2305_v56 = vld [vmem:[#allocation10 + $0x110] sm:$0xff] }
 0x286   :  { %652 = vmatprep.subr.mxu1 %v2284_v24  ;;  %2802 = vst [vmem:[#allocation42_spill] sm:$0xff] %v2305_v56  ;;  %v2308_v24 = vld [vmem:[#allocation10 + $0xf8] sm:$0xff] }
 0x287   :  { %653 = vmatpush1.msra.mxu1 %v2287_v25  ;;  %2803 = vst [vmem:[#allocation43_spill] sm:$0xff] %v2308_v24  ;;  %v2311_v25 = vld [vmem:[#allocation10 + $0xf0] sm:$0xff] }
 0x288   :  { %654 = vmatprep.subr.mxu1 %v2290_v26  ;;  %2804 = vst [vmem:[#allocation44_spill] sm:$0xff] %v2311_v25  ;;  %v2314_v26 = vld [vmem:[#allocation10 + $0xd8] sm:$0xff] }
 0x289   :  { %655 = vmatpush1.msra.mxu1 %v2293_v54  ;;  %2805 = vst [vmem:[#allocation45_spill] sm:$0xff] %v2314_v26  ;;  %v2317_v54 = vld [vmem:[#allocation10 + $0xd0] sm:$0xff] }
 0x28a   :  { %656 = vmatprep.subr.mxu1 %v2296_v27  ;;  %2806 = vst [vmem:[#allocation46_spill] sm:$0xff] %v2317_v54  ;;  %v2320_v27 = vld [vmem:[#allocation10 + $0xb8] sm:$0xff] }
 0x28b   :  { %657 = vmatpush1.msra.mxu1 %v2299_v51  ;;  %2807 = vst [vmem:[#allocation47_spill] sm:$0xff] %v2320_v27  ;;  %v2323_v51 = vld [vmem:[#allocation10 + $0xb0] sm:$0xff] }
 0x28c   :  { %658 = vmatprep.subr.mxu1 %v2302_v50  ;;  %2808 = vst [vmem:[#allocation48_spill] sm:$0xff] %v2323_v51  ;;  %v2326_v50 = vld [vmem:[#allocation10 + $0x98] sm:$0xff] }
 0x28d   :  { %659 = vmatpush1.msra.mxu1 %v2305_v56  ;;  %2809 = vst [vmem:[#allocation49_spill] sm:$0xff] %v2326_v50  ;;  %v2329_v56 = vld [vmem:[#allocation10 + $0x90] sm:$0xff] }
 0x28e   :  { %660 = vmatprep.subr.mxu1 %v2308_v24  ;;  %2810 = vst [vmem:[#allocation50_spill] sm:$0xff] %v2329_v56  ;;  %v2332_v24 = vld [vmem:[#allocation10 + $0x78] sm:$0xff] }
 0x28f   :  { %661 = vmatpush1.msra.mxu1 %v2311_v25  ;;  %2811 = vst [vmem:[#allocation51_spill] sm:$0xff] %v2332_v24  ;;  %v2335_v25 = vld [vmem:[#allocation10 + $0x70] sm:$0xff] }
 0x290   :  { %662 = vmatprep.subr.mxu1 %v2314_v26  ;;  %2812 = vst [vmem:[#allocation52_spill] sm:$0xff] %v2335_v25  ;;  %v2338_v26 = vld [vmem:[#allocation10 + $0x58] sm:$0xff] }
 0x291   :  { %663 = vmatpush1.msra.mxu1 %v2317_v54  ;;  %2813 = vst [vmem:[#allocation53_spill] sm:$0xff] %v2338_v26  ;;  %v2341_v54 = vld [vmem:[#allocation10 + $0x50] sm:$0xff] }
 0x292   :  { %664 = vmatprep.subr.mxu1 %v2320_v27  ;;  %2814 = vst [vmem:[#allocation54_spill] sm:$0xff] %v2341_v54  ;;  %v2344_v27 = vld [vmem:[#allocation10 + $0x38] sm:$0xff] }
 0x293   :  { %665 = vmatpush1.msra.mxu1 %v2323_v51  ;;  %2815 = vst [vmem:[#allocation55_spill] sm:$0xff] %v2344_v27  ;;  %v2351_v51 = vld [vmem:[#allocation10 + $0x30] sm:$0xff] }
 0x294   :  { %666 = vmatprep.subr.mxu1 %v2326_v50  ;;  %v2349_v50 = vld [vmem:[#allocation10 + $0x20] sm:$0xff]  ;;  %2817 = vst [vmem:[#allocation57_spill] sm:$0xff] %v2351_v51 }
 0x295   :  { %667 = vmatpush1.msra.mxu1 %v2329_v56  ;;  %2816 = vst [vmem:[#allocation56_spill] sm:$0xff] %v2349_v50  ;;  %602 = vmatpush1.msra.mxu0 %v2349_v50  ;;  %v2357_v56 = vld [vmem:[#allocation10 + $0x18] sm:$0xff] }
 0x296   :  { %668 = vmatprep.subr.mxu1 %v2332_v24  ;;  %v2355_v24 = vld [vmem:[#allocation10 + $0x8] sm:$0xff]  ;;  %2819 = vst [vmem:[#allocation59_spill] sm:$0xff] %v2357_v56 }
 0x297   :  { %669 = vmatpush1.msra.mxu1 %v2335_v25  ;;  %2818 = vst [vmem:[#allocation58_spill] sm:$0xff] %v2355_v24  ;;  %603 = vmatprep.subr.mxu0 %v2355_v24 }
 0x298   :  { %670 = vmatprep.subr.mxu1 %v2338_v26  ;;  %v2361_v26 = vld [vmem:[#allocation10] sm:$0xff] }
 0x299   :  { %671 = vmatpush1.msra.mxu1 %v2341_v54  ;;  %2820 = vst [vmem:[#allocation60_spill] sm:$0xff] %v2361_v26  ;;  %v2363_v54 = vld [vmem:[#allocation10 + $0x10] sm:$0xff]  ;;  %604 = vmatpush1.msra.mxu0 %v2361_v26 }
 0x29a   :  { %672 = vmatprep.subr.mxu1 %v2344_v27  ;;  %1591 = vmatprep.subr.mxu0 %v2791_v32 }
 0x29b   :  { %673 = vmatpush1.msra.mxu1 %v2351_v51  ;;  %v2369_v51 = vpop.f32.mrf.mxu1 }
 0x29c   :  { %674 = vmatprep.subr.mxu1 %v2357_v56 }
 0x29d   :  { %675 = vmatpush1.msra.mxu1 %v2363_v54  ;;  %v2371_v27 = vpop.f32.mrf.mxu1 }
 0x29e   :  { %1626 = vmatprep.subr.mxu1 %v2791_v32 }
 0x33e   :  { %v568_v25 = vpop.f32.mrf.mxu1 }
 0x33f   :  { %v572_v55 = vadd.f32 %v568_v25, %v2020_v33 }
 0x340   :  { %v1590_v56 = vpop.f32.mrf.mxu1 }
 0x341   :  { %638 = vmatmul.mubr.f32.vlgmr.msra.gmra.mxu0 %v572_v55  ;;  %709 = vmatmul.mubr.f32.vlgmr.msra.gmra.mxu1 %v572_v55 }
 0x342   :  { %1592 = vmatpush3.msra.mxu0 %v2022_v34  ;;  %1623 = vmatprep.mubr.msk.f32.mxu0 %vm1959_vm0, %v2791_v32  ;;  %v2821_v34 = vlaneseq }
 0x343   :  { %1593 = vmatprep.subr.mxu0 %v2791_v32  ;;  %1627 = vmatpush3.msra.mxu1 %v2102_v28 }
 0x344   :  { %1594 = vmatpush3.msra.mxu0 %v2026_v35  ;;  %1628 = vmatprep.subr.mxu1 %v2791_v32  ;;  %v254_v35 = vshrl.u32 %v2821_v34, 7 }
 0x345   :  { %1595 = vmatprep.subr.mxu0 %v2791_v32  ;;  %1629 = vmatpush3.msra.mxu1 %v2106_v29 }
 0x346   :  { %1596 = vmatpush3.msra.mxu0 %v2032_v36  ;;  %1630 = vmatprep.subr.mxu1 %v2791_v32  ;;  %v255_v36 = vsub.s32 0, %v254_v35  ;;  %v263_v25 = vsub.s32 2, %v254_v35 }
 0x347   :  { %1597 = vmatprep.subr.mxu0 %v2791_v32  ;;  %1631 = vmatpush3.msra.mxu1 %v2112_v30 }
 0x348   :  { %1598 = vmatpush3.msra.mxu0 %v2036_v37  ;;  %1632 = vmatprep.subr.mxu1 %v2791_v32  ;;  %v251_v37 = vld [vmem:[%s2683_s5] sm:$0xf]  ;;  %s1961_s5 = smov [#allocation11]  }
 0x349   :  { %1599 = vmatprep.subr.mxu0 %v2791_v32  ;;  %1633 = vmatpush3.msra.mxu1 %v2116_v31  ;;  %s1399_s23 = sshll.u32 %s1961_s5, 4  ;;  %s1400_s23 = int_to_ptr.vmem [resolvable:$true] %s1399_s23 }
 0x34a   :  { %1600 = vmatpush3.msra.mxu0 %v2040_v38  ;;  %1634 = vmatprep.subr.mxu1 %v2791_v32  ;;  %v259_v38 = vsub.s32 1, %v254_v35  ;;  %s1921_s24 = scalar_lea.vmem %s1400_s23, 128  ;;  %p1926_p12 = scmp.lt.s32.totalorder %s1400_s23, %s1400_s23 }
 0x34b   :  { %1601 = vmatprep.subr.mxu0 %v2791_v32  ;;  %1635 = vmatpush3.msra.mxu1 %v2126_v58  ;;  %p1922_p11 = scmp.ne.s32.totalorder %s1400_s23, %s1921_s24  ;;  %p1927_p13 = scmp.lt.s32.totalorder %s1921_s24, %s1921_s24 }
 0x34c   :  { %1602 = vmatpush3.msra.mxu0 %v2044_v39  ;;  %1636 = vmatprep.subr.mxu1 %v2791_v32  ;;  %v256_v39 = vrot.slane %v251_v37, %v255_v36  ;;  %v264_v36 = vrot.slane %v251_v37, %v263_v25 }
 0x34d   :  { %1603 = vmatprep.subr.mxu0 %v2791_v32  ;;  %1637 = vmatpush3.msra.mxu1 %v2130_v59  ;;  %p1928_p0 = por %p1927_p13, %p1926_p12 }
 0x34e   :  { %1604 = vmatpush3.msra.mxu0 %v2048_v40  ;;  %1638 = vmatprep.subr.mxu1 %v2791_v32  ;;  %v260_v40 = vrot.slane %v251_v37, %v259_v38  ;;  %v2459_v38 = vadd.f32 %v2369_v51, %v264_v36 }
 0x34f   :  { %1605 = vmatprep.subr.mxu0 %v2791_v32  ;;  %1639 = vmatpush3.msra.mxu1 %v2134_v60  ;;  %p1929_p1 = pnand %p1928_p0, %p1922_p11 }
 0x350   :  { %1606 = vmatpush3.msra.mxu0 %v2052_v41  ;;  %1640 = vmatprep.subr.mxu1 %v2791_v32  ;;  %v2447_v41 = vadd.f32 %v2092_v52, %v256_v39 }
 0x351   :  { %1607 = vmatprep.subr.mxu0 %v2791_v32  ;;  %1641 = vmatpush3.msra.mxu1 %v2138_v57 }
 0x352   :  { %1608 = vmatpush3.msra.mxu0 %v2056_v42  ;;  %1642 = vmatprep.subr.mxu1 %v2791_v32 }
 0x353   :  { %1609 = vmatprep.subr.mxu0 %v2791_v32  ;;  %1643 = vmatpush3.msra.mxu1 %v2142_v61 }
 0x354   :  { %1610 = vmatpush3.msra.mxu0 %v2060_v43  ;;  %1644 = vmatprep.subr.mxu1 %v2791_v32  ;;  %v2450_v43 = vadd.f32 %v2094_v53, %v260_v40 }
 0x355   :  { %1611 = vmatprep.subr.mxu0 %v2791_v32  ;;  %1645 = vmatpush3.msra.mxu1 %v2146_v62 }
 0x356   :  { %1612 = vmatpush3.msra.mxu0 %v2064_v44  ;;  %1646 = vmatprep.subr.mxu1 %v2791_v32 }
 0x357   :  { %1613 = vmatprep.subr.mxu0 %v2791_v32  ;;  %1647 = vmatpush3.msra.mxu1 %v2150_v63 }
 0x358   :  { %1614 = vmatpush3.msra.mxu0 %v2068_v45  ;;  %1648 = vmatprep.subr.mxu1 %v2791_v32  ;;  %v267_v45 = vsub.s32 3, %v254_v35 }
 0x359   :  { %1615 = vmatprep.subr.mxu0 %v2791_v32  ;;  %1649 = vmatpush3.msra.mxu1 %v2154_v1 }
 0x35a   :  { %1616 = vmatpush3.msra.mxu0 %v2072_v46  ;;  %1650 = vmatprep.subr.mxu1 %v2791_v32  ;;  %v268_v56 = vrot.slane %v251_v37, %v267_v45 }
 0x35b   :  { %1617 = vmatprep.subr.mxu0 %v2791_v32  ;;  %1651 = vmatpush3.msra.mxu1 %v2158_v2 }
 0x35c   :  { %1618 = vmatpush3.msra.mxu0 %v2076_v47  ;;  %1652 = vmatprep.subr.mxu1 %v2791_v32  ;;  %v2455_v52 = vadd.f32 %v2371_v27, %v268_v56 }
 0x35d   :  { %1619 = vmatprep.subr.mxu0 %v2791_v32  ;;  %1653 = vmatpush3.msra.mxu1 %v2162_v3 }
 0x35e   :  { %1620 = vmatpush3.msra.mxu0 %v2080_v48  ;;  %1654 = vmatprep.subr.mxu1 %v2791_v32 }
 0x35f   :  { %1621 = vmatprep.subr.mxu0 %v2791_v32  ;;  %1655 = vmatpush3.msra.mxu1 %v2166_v4 }
 0x360   :  { %1622 = vmatpush3.msra.mxu0 %v2084_v49  ;;  %1656 = vmatprep.subr.mxu1 %v2791_v32 }
 0x361   :  { %1657 = vmatpush3.msra.mxu1 %v2170_v5  ;;  %1658 = vmatprep.mubr.msk.f32.mxu1 %vm1959_vm0, %v2791_v32 }
 0x362   :  { %897 = vmatprep.subr.mxu0 %v2173_v6  ;;  %968 = vmatprep.subr.mxu1 %v2175_v7 }
 0x401   :  { %v639_v42 = vpop.f32.mrf.mxu0  ;;  %v710_v49 = vpop.f32.mrf.mxu1 }
 0x402   :  { %v715_v44 = vadd.f32 %v639_v42, %v2447_v41  ;;  %v717_v42 = vadd.f32 %v710_v49, %v2459_v38 }
 0x403   :  { %v641_v46 = vpop.f32.mrf.mxu0  ;;  %v712_v34 = vpop.f32.mrf.mxu1 }
 0x404   :  { %v1410_v47 = vmul.f32 -1.442695, %v715_v44  ;;  %v716_v48 = vadd.f32 %v641_v46, %v2450_v43  ;;  %v718_v53 = vadd.f32 %v712_v34, %v2455_v52 }
 0x406   :  { %1748 = vpow2.f32 %v1410_v47  ;;  %v1411_v55 = vmul.f32 -1.442695, %v716_v48  ;;  %v1412_v39 = vmul.f32 -1.442695, %v718_v53  ;;  %v2823_v53 = vld [vmem:[#allocation18_spill] sm:$0xff] }
 0x408   :  { %1750 = vpow2.f32 %v1411_v55 }
 0x409   :  { %1752 = vpow2.f32 %v1412_v39  ;;  %v2824_v39 = vld [vmem:[#allocation19_spill] sm:$0xff] }
 0x413   :  { %v1749_v40 = vpop.eup %1748 }
 0x414   :  { %v722_v44 = vadd.f32 1.0, %v1749_v40  ;;  %v2825_v40 = vld [vmem:[#allocation20_spill] sm:$0xff] }
 0x415   :  { %v1751_v46 = vpop.eup %1750 }
 0x416   :  { %1754 = vrcp.f32 %v722_v44  ;;  %v728_v45 = vadd.f32 1.0, %v1751_v46  ;;  %v1753_v35 = vpop.eup %1752  ;;  %v2827_v44 = vld [vmem:[#allocation22_spill] sm:$0xff]  ;;  %v2828_v46 = vld [vmem:[#allocation23_spill] sm:$0xff] }
 0x417   :  { %1756 = vtanh.f32 %v717_v42  ;;  %v735_v48 = vadd.f32 1.0, %v1753_v35  ;;  %v2826_v42 = vld [vmem:[#allocation21_spill] sm:$0xff] }
 0x418   :  { %1758 = vrcp.f32 %v728_v45  ;;  %v2829_v45 = vld [vmem:[#allocation24_spill] sm:$0xff]  ;;  %v2830_v35 = vld [vmem:[#allocation25_spill] sm:$0xff] }
 0x419   :  { %1760 = vrcp.f32 %v735_v48  ;;  %v2834_v48 = vld [vmem:[#allocation29_spill] sm:$0xff] }
 0x423   :  { %v1755_v27 = vpop.eup %1754 }
 0x424   :  { %v1757_v47 = vpop.eup %1756 }
 0x425   :  { %v1759_v37 = vpop.eup %1758  ;;  %v739_v56 = vmul.f32 %v1757_v47, %v1755_v27  ;;  %v2831_v27 = vld [vmem:[#allocation26_spill] sm:$0xff]  ;;  %v2832_v47 = vld [vmem:[#allocation27_spill] sm:$0xff] }
 0x426   :  { %v738_v55 = vmul.f32 0.0, %v1759_v37  ;;  %v1761_v49 = vpop.eup %1760  ;;  %v2833_v37 = vld [vmem:[#allocation28_spill] sm:$0xff] }
 0x428   :  { %v2462_v51 = vadd.f32 %v739_v56, %v738_v55  ;;  %v2835_v56 = vld [vmem:[#allocation16_spill] sm:$0xff] }
 0x42a   :  { %1762 = vtanh.f32 %v2462_v51 }
 0x437   :  { %v1763_v25 = vpop.eup %1762 }
 0x438   :  { %v742_v34 = vmul.f32 %v1763_v25, %v1761_v49 }
 0x43a   :  { %v2466_v36 = vadd.f32 %v742_v34, %v2020_v33  ;;  %v2822_v33 = vld [vmem:[#allocation17_spill] sm:$0xff] }
 0x43c   :  { %1624 = vmatmul.mubr.f32.vlgmr.msra.gmra.mxu0 %v2466_v36 }
 0x43d   :  { %898 = vmatpush1.msra.mxu0 %v2177_v8  ;;  %961 = vmatprep.mubr.f32.mxu0 %v2791_v32 }
 0x43e   :  { %899 = vmatprep.subr.mxu0 %v2181_v9 }
 0x43f   :  { %900 = vmatpush1.msra.mxu0 %v2184_v10 }
 0x440   :  { %901 = vmatprep.subr.mxu0 %v2187_v11 }
 0x441   :  { %902 = vmatpush1.msra.mxu0 %v2190_v12 }
 0x442   :  { %903 = vmatprep.subr.mxu0 %v2193_v13 }
 0x443   :  { %904 = vmatpush1.msra.mxu0 %v2196_v14 }
 0x444   :  { %905 = vmatprep.subr.mxu0 %v2199_v15 }
 0x445   :  { %906 = vmatpush1.msra.mxu0 %v2202_v16 }
 0x446   :  { %907 = vmatprep.subr.mxu0 %v2205_v17 }
 0x447   :  { %908 = vmatpush1.msra.mxu0 %v2208_v18 }
 0x448   :  { %909 = vmatprep.subr.mxu0 %v2211_v19 }
 0x449   :  { %910 = vmatpush1.msra.mxu0 %v2214_v20 }
 0x44a   :  { %911 = vmatprep.subr.mxu0 %v2217_v21 }
 0x44b   :  { %912 = vmatpush1.msra.mxu0 %v2220_v22 }
 0x44c   :  { %913 = vmatprep.subr.mxu0 %v2822_v33 }
 0x44d   :  { %914 = vmatpush1.msra.mxu0 %v2823_v53 }
 0x44e   :  { %915 = vmatprep.subr.mxu0 %v2824_v39 }
 0x44f   :  { %916 = vmatpush1.msra.mxu0 %v2825_v40 }
 0x450   :  { %917 = vmatprep.subr.mxu0 %v2826_v42 }
 0x451   :  { %918 = vmatpush1.msra.mxu0 %v2827_v44 }
 0x452   :  { %919 = vmatprep.subr.mxu0 %v2828_v46 }
 0x453   :  { %920 = vmatpush1.msra.mxu0 %v2829_v45 }
 0x454   :  { %921 = vmatprep.subr.mxu0 %v2830_v35 }
 0x455   :  { %922 = vmatpush1.msra.mxu0 %v2831_v27 }
 0x456   :  { %923 = vmatprep.subr.mxu0 %v2832_v47 }
 0x457   :  { %924 = vmatpush1.msra.mxu0 %v2833_v37 }
 0x458   :  { %925 = vmatprep.subr.mxu0 %v2834_v48 }
 0x459   :  { %926 = vmatpush1.msra.mxu0 %v2349_v50 }
 0x45a   :  { %927 = vmatprep.subr.mxu0 %v2355_v24 }
 0x45b   :  { %928 = vmatpush1.msra.mxu0 %v2361_v26 }
 0x45c   :  { %1661 = vmatprep.subr.mxu0 %v2791_v32 }
 0x4fc   :  { %v810_v55 = vpop.f32.mrf.mxu0 }
 0x4fd   :  { %v811_v49 = vadd.f32 %v810_v55, %v2835_v56  ;;  %v2836_v55 = vld [vmem:[#allocation30_spill] sm:$0xff] }
 0x4fe   :  { %v1625_v25 = vpop.f32.mrf.mxu0 }
 0x4ff   :  { %814 = vmax.xlane.f32.xlu1 %v811_v49  ;;  %v2840_v25 = vld [vmem:[#allocation34_spill] sm:$0xff] }
 0x588   :  { %v815_v34 = vpop.xlane.xlu1 %814 }
 0x589   :  { %v816_v27 = vsub.f32 %v811_v49, %v815_v34  ;;  %v2839_v49 = vld [vmem:[#allocation33_spill] sm:$0xff]  ;;  %v2848_v34 = vld [vmem:[#allocation42_spill] sm:$0xff] }
 0x58b   :  { %v817_v47 = vmul.f32 1.442695, %v816_v27  ;;  %v2837_v27 = vld [vmem:[#allocation31_spill] sm:$0xff] }
 0x58d   :  { %1764 = vpow2.f32 %v817_v47  ;;  %v2838_v47 = vld [vmem:[#allocation32_spill] sm:$0xff] }
 0x59a   :  { %v1765_v37 = vpop.eup %1764 }
 0x59b   :  { %819 = vadd.xlane.f32.xlu1 %v1765_v37 }
 0x624   :  { %v820_v48 = vpop.xlane.xlu1 %819 }
 0x625   :  { %1766 = vrcp.f32 %v820_v48 }
 0x632   :  { %v1767_v50 = vpop.eup %1766 }
 0x633   :  { %v822_v35 = vmul.f32 %v1767_v50, %v820_v48  ;;  %v2847_v48 = vld [vmem:[#allocation41_spill] sm:$0xff] }
 0x635   :  { %v823_v24 = vsub.f32 2.0, %v822_v35  ;;  %v2841_v35 = vld [vmem:[#allocation35_spill] sm:$0xff] }
 0x637   :  { %v824_v45 = vmul.f32 %v1767_v50, %v823_v24  ;;  %v2842_v50 = vld [vmem:[#allocation36_spill] sm:$0xff]  ;;  %v2843_v24 = vld [vmem:[#allocation37_spill] sm:$0xff] }
 0x639   :  { %v825_v26 = vmul.f32 %v1765_v37, %v824_v45  ;;  %v2845_v45 = vld [vmem:[#allocation39_spill] sm:$0xff]  ;;  %v2846_v37 = vld [vmem:[#allocation40_spill] sm:$0xff] }
 0x63b   :  { %1659 = vmatmul.mubr.f32.vlgmr.msra.gmra.mxu1 %v825_v26  ;;  %v2844_v26 = vld [vmem:[#allocation38_spill] sm:$0xff] }
 0x63c   :  { %969 = vmatpush1.msra.mxu1 %v2264_v23  ;;  %1032 = vmatprep.mubr.f32.mxu1 %v2791_v32 }
 0x63d   :  { %970 = vmatprep.subr.mxu1 %v2266_v0 }
 0x63e   :  { %971 = vmatpush1.msra.mxu1 %v2836_v55 }
 0x63f   :  { %972 = vmatprep.subr.mxu1 %v2837_v27 }
 0x640   :  { %973 = vmatpush1.msra.mxu1 %v2838_v47  ;;  %v2849_v47 = vld [vmem:[#allocation43_spill] sm:$0xff] }
 0x641   :  { %974 = vmatprep.subr.mxu1 %v2839_v49  ;;  %v2850_v49 = vld [vmem:[#allocation44_spill] sm:$0xff] }
 0x642   :  { %975 = vmatpush1.msra.mxu1 %v2840_v25  ;;  %v2851_v25 = vld [vmem:[#allocation45_spill] sm:$0xff] }
 0x643   :  { %976 = vmatprep.subr.mxu1 %v2841_v35  ;;  %v2852_v35 = vld [vmem:[#allocation46_spill] sm:$0xff] }
 0x644   :  { %977 = vmatpush1.msra.mxu1 %v2842_v50  ;;  %v2853_v50 = vld [vmem:[#allocation47_spill] sm:$0xff] }
 0x645   :  { %978 = vmatprep.subr.mxu1 %v2843_v24  ;;  %v2854_v24 = vld [vmem:[#allocation48_spill] sm:$0xff] }
 0x646   :  { %979 = vmatpush1.msra.mxu1 %v2844_v26  ;;  %v2855_v26 = vld [vmem:[#allocation49_spill] sm:$0xff] }
 0x647   :  { %980 = vmatprep.subr.mxu1 %v2845_v45  ;;  %v2856_v45 = vld [vmem:[#allocation50_spill] sm:$0xff] }
 0x648   :  { %981 = vmatpush1.msra.mxu1 %v2846_v37  ;;  %v2857_v37 = vld [vmem:[#allocation51_spill] sm:$0xff] }
 0x649   :  { %982 = vmatprep.subr.mxu1 %v2847_v48  ;;  %v2858_v48 = vld [vmem:[#allocation52_spill] sm:$0xff] }
 0x64a   :  { %983 = vmatpush1.msra.mxu1 %v2848_v34  ;;  %v2859_v34 = vld [vmem:[#allocation53_spill] sm:$0xff] }
 0x64b   :  { %984 = vmatprep.subr.mxu1 %v2849_v47  ;;  %v2860_v47 = vld [vmem:[#allocation54_spill] sm:$0xff] }
 0x64c   :  { %985 = vmatpush1.msra.mxu1 %v2850_v49  ;;  %v2861_v49 = vld [vmem:[#allocation55_spill] sm:$0xff] }
 0x64d   :  { %986 = vmatprep.subr.mxu1 %v2851_v25  ;;  %v2862_v25 = vld [vmem:[#allocation57_spill] sm:$0xff] }
 0x64e   :  { %987 = vmatpush1.msra.mxu1 %v2852_v35  ;;  %v2863_v35 = vld [vmem:[#allocation59_spill] sm:$0xff] }
 0x64f   :  { %988 = vmatprep.subr.mxu1 %v2853_v50 }
 0x650   :  { %989 = vmatpush1.msra.mxu1 %v2854_v24 }
 0x651   :  { %990 = vmatprep.subr.mxu1 %v2855_v26 }
 0x652   :  { %991 = vmatpush1.msra.mxu1 %v2856_v45 }
 0x653   :  { %992 = vmatprep.subr.mxu1 %v2857_v37 }
 0x654   :  { %993 = vmatpush1.msra.mxu1 %v2858_v48  ;;  %v1804_v48 = vld [vmem:[#allocation5 + $0x78] sm:$0xff] }
 0x655   :  { %994 = vmatprep.subr.mxu1 %v2859_v34 }
 0x656   :  { %995 = vmatpush1.msra.mxu1 %v2860_v47 }
 0x657   :  { %996 = vmatprep.subr.mxu1 %v2861_v49 }
 0x658   :  { %997 = vmatpush1.msra.mxu1 %v2862_v25 }
 0x659   :  { %998 = vmatprep.subr.mxu1 %v2863_v35  ;;  %v1805_v35 = vld [vmem:[#allocation5 + $0x70] sm:$0xff] }
 0x65a   :  { %999 = vmatpush1.msra.mxu1 %v2363_v54 }
 0x65b   :  { %1696 = vmatprep.subr.mxu1 %v2791_v32 }
 0x6fb   :  { %v892_v26 = vpop.f32.mrf.mxu1 }
 0x6fc   :  { %v896_v45 = vadd.f32 %v892_v26, %v2466_v36  ;;  %v1806_v36 = vld [vmem:[#allocation5 + $0x68] sm:$0xff]  ;;  %v1807_v26 = vld [vmem:[#allocation5 + $0x60] sm:$0xff] }
 0x6fd   :  { %v1660_v37 = vpop.f32.mrf.mxu1 }
 0x6fe   :  { %962 = vmatmul.mubr.f32.vlgmr.msra.gmra.mxu0 %v896_v45  ;;  %1033 = vmatmul.mubr.f32.vlgmr.msra.gmra.mxu1 %v896_v45 }
 0x6ff   :  { %1662 = vmatpush3.msra.mxu0 %v1804_v48  ;;  %1693 = vmatprep.mubr.msk.f32.mxu0 %vm1959_vm0, %v2791_v32 }
 0x700   :  { %1663 = vmatprep.subr.mxu0 %v2791_v32  ;;  %1697 = vmatpush3.msra.mxu1 %v2102_v28  ;;  %v1808_v28 = vld [vmem:[#allocation5 + $0x58] sm:$0xff] }
 0x701   :  { %1664 = vmatpush3.msra.mxu0 %v1805_v35  ;;  %1698 = vmatprep.subr.mxu1 %v2791_v32 }
 0x702   :  { %1665 = vmatprep.subr.mxu0 %v2791_v32  ;;  %1699 = vmatpush3.msra.mxu1 %v2106_v29  ;;  %v1809_v29 = vld [vmem:[#allocation5 + $0x50] sm:$0xff] }
 0x703   :  { %1666 = vmatpush3.msra.mxu0 %v1806_v36  ;;  %1700 = vmatprep.subr.mxu1 %v2791_v32 }
 0x704   :  { %1667 = vmatprep.subr.mxu0 %v2791_v32  ;;  %1701 = vmatpush3.msra.mxu1 %v2112_v30  ;;  %v1810_v30 = vld [vmem:[#allocation5 + $0x48] sm:$0xff] }
 0x705   :  { %1668 = vmatpush3.msra.mxu0 %v1807_v26  ;;  %1702 = vmatprep.subr.mxu1 %v2791_v32 }
 0x706   :  { %1669 = vmatprep.subr.mxu0 %v2791_v32  ;;  %1703 = vmatpush3.msra.mxu1 %v2116_v31  ;;  %v1811_v31 = vld [vmem:[#allocation5 + $0x40] sm:$0xff] }
 0x707   :  { %1670 = vmatpush3.msra.mxu0 %v1808_v28  ;;  %1704 = vmatprep.subr.mxu1 %v2791_v32 }
 0x708   :  { %1671 = vmatprep.subr.mxu0 %v2791_v32  ;;  %1705 = vmatpush3.msra.mxu1 %v2126_v58  ;;  %v1812_v58 = vld [vmem:[#allocation5 + $0x38] sm:$0xff] }
 0x709   :  { %1672 = vmatpush3.msra.mxu0 %v1809_v29  ;;  %1706 = vmatprep.subr.mxu1 %v2791_v32 }
 0x70a   :  { %1673 = vmatprep.subr.mxu0 %v2791_v32  ;;  %1707 = vmatpush3.msra.mxu1 %v2130_v59  ;;  %v1813_v59 = vld [vmem:[#allocation5 + $0x30] sm:$0xff] }
 0x70b   :  { %1674 = vmatpush3.msra.mxu0 %v1810_v30  ;;  %1708 = vmatprep.subr.mxu1 %v2791_v32 }
 0x70c   :  { %1675 = vmatprep.subr.mxu0 %v2791_v32  ;;  %1709 = vmatpush3.msra.mxu1 %v2134_v60  ;;  %v1814_v60 = vld [vmem:[#allocation5 + $0x28] sm:$0xff] }
 0x70d   :  { %1676 = vmatpush3.msra.mxu0 %v1811_v31  ;;  %1710 = vmatprep.subr.mxu1 %v2791_v32 }
 0x70e   :  { %1677 = vmatprep.subr.mxu0 %v2791_v32  ;;  %1711 = vmatpush3.msra.mxu1 %v2138_v57  ;;  %v1815_v57 = vld [vmem:[#allocation5 + $0x20] sm:$0xff] }
 0x70f   :  { %1678 = vmatpush3.msra.mxu0 %v1812_v58  ;;  %1712 = vmatprep.subr.mxu1 %v2791_v32 }
 0x710   :  { %1679 = vmatprep.subr.mxu0 %v2791_v32  ;;  %1713 = vmatpush3.msra.mxu1 %v2142_v61  ;;  %v1816_v61 = vld [vmem:[#allocation5 + $0x18] sm:$0xff] }
 0x711   :  { %1680 = vmatpush3.msra.mxu0 %v1813_v59  ;;  %1714 = vmatprep.subr.mxu1 %v2791_v32 }
 0x712   :  { %1681 = vmatprep.subr.mxu0 %v2791_v32  ;;  %1715 = vmatpush3.msra.mxu1 %v2146_v62  ;;  %v1817_v62 = vld [vmem:[#allocation5 + $0x10] sm:$0xff] }
 0x713   :  { %1682 = vmatpush3.msra.mxu0 %v1814_v60  ;;  %1716 = vmatprep.subr.mxu1 %v2791_v32 }
 0x714   :  { %1683 = vmatprep.subr.mxu0 %v2791_v32  ;;  %1717 = vmatpush3.msra.mxu1 %v2150_v63  ;;  %v1818_v63 = vld [vmem:[#allocation5 + $0x8] sm:$0xff] }
 0x715   :  { %1684 = vmatpush3.msra.mxu0 %v1815_v57  ;;  %1718 = vmatprep.subr.mxu1 %v2791_v32 }
 0x716   :  { %1685 = vmatprep.subr.mxu0 %v2791_v32  ;;  %1719 = vmatpush3.msra.mxu1 %v2154_v1  ;;  %v1819_v1 = vld [vmem:[#allocation5] sm:$0xff] }
 0x717   :  { %1686 = vmatpush3.msra.mxu0 %v1816_v61  ;;  %1720 = vmatprep.subr.mxu1 %v2791_v32 }
 0x718   :  { %1687 = vmatprep.subr.mxu0 %v2791_v32  ;;  %1721 = vmatpush3.msra.mxu1 %v2158_v2 }
 0x719   :  { %1688 = vmatpush3.msra.mxu0 %v1817_v62  ;;  %1722 = vmatprep.subr.mxu1 %v2791_v32 }
 0x71a   :  { %1689 = vmatprep.subr.mxu0 %v2791_v32  ;;  %1723 = vmatpush3.msra.mxu1 %v2162_v3 }
 0x71b   :  { %1690 = vmatpush3.msra.mxu0 %v1818_v63  ;;  %1724 = vmatprep.subr.mxu1 %v2791_v32 }
 0x71c   :  { %1691 = vmatprep.subr.mxu0 %v2791_v32  ;;  %1725 = vmatpush3.msra.mxu1 %v2166_v4 }
 0x71d   :  { %1692 = vmatpush3.msra.mxu0 %v1819_v1  ;;  %1726 = vmatprep.subr.mxu1 %v2791_v32 }
 0x71e   :  { %1727 = vmatpush3.msra.mxu1 %v2170_v5  ;;  %1728 = vmatprep.mubr.msk.f32.mxu1 %vm1959_vm0, %v2791_v32 }
 0x71f   :  { %1221 = vmatprep.subr.mxu0 %v2173_v6  ;;  %1292 = vmatprep.subr.mxu1 %v2175_v7 }
 0x7be   :  { %v963_v2 = vpop.f32.mrf.mxu0  ;;  %v1034_v37 = vpop.f32.mrf.mxu1 }
 0x7bf   :  { %v1039_v3 = vadd.f32 %v963_v2, %v2447_v41  ;;  %v1041_v6 = vadd.f32 %v1034_v37, %v2459_v38  ;;  %v2876_v37 = vld [vmem:[#allocation35_spill] sm:$0xff] }
 0x7c0   :  { %v965_v35 = vpop.f32.mrf.mxu0  ;;  %v1036_v36 = vpop.f32.mrf.mxu1 }
 0x7c1   :  { %v1413_v45 = vmul.f32 -1.442695, %v1039_v3  ;;  %v1040_v4 = vadd.f32 %v965_v35, %v2450_v43  ;;  %v1042_v5 = vadd.f32 %v1036_v36, %v2455_v52  ;;  %v2597_v35 = vld [vmem:[#allocation7] sm:$0xff]  ;;  %v2878_v36 = vld [vmem:[#allocation37_spill] sm:$0xff] }
 0x7c3   :  { %1768 = vpow2.f32 %v1413_v45  ;;  %v1414_v48 = vmul.f32 -1.442695, %v1040_v4  ;;  %v1415_v26 = vmul.f32 -1.442695, %v1042_v5  ;;  %v2875_v4 = vld [vmem:[#allocation34_spill] sm:$0xff]  ;;  %v2884_v5 = vld [vmem:[#allocation43_spill] sm:$0xff] }
 0x7c5   :  { %1770 = vpow2.f32 %v1414_v48  ;;  %v2877_v48 = vld [vmem:[#allocation36_spill] sm:$0xff] }
 0x7c6   :  { %1772 = vpow2.f32 %v1415_v26  ;;  %v2885_v26 = vld [vmem:[#allocation44_spill] sm:$0xff] }
 0x7d0   :  { %v1769_v28 = vpop.eup %1768 }
 0x7d1   :  { %v1046_v29 = vadd.f32 1.0, %v1769_v28  ;;  %v2886_v28 = vld [vmem:[#allocation45_spill] sm:$0xff] }
 0x7d2   :  { %v1771_v7 = vpop.eup %1770 }
 0x7d3   :  { %1774 = vrcp.f32 %v1046_v29  ;;  %v1052_v30 = vadd.f32 1.0, %v1771_v7  ;;  %v1773_v31 = vpop.eup %1772  ;;  %v2888_v29 = vld [vmem:[#allocation49_spill] sm:$0xff]  ;;  %v2889_v7 = vld [vmem:[#allocation50_spill] sm:$0xff] }
 0x7d4   :  { %1776 = vtanh.f32 %v1041_v6  ;;  %v1059_v57 = vadd.f32 1.0, %v1773_v31  ;;  %v2887_v6 = vld [vmem:[#allocation46_spill] sm:$0xff]  ;;  %v2891_v31 = vld [vmem:[#allocation52_spill] sm:$0xff] }
 0x7d5   :  { %1778 = vrcp.f32 %v1052_v30  ;;  %v2890_v30 = vld [vmem:[#allocation51_spill] sm:$0xff] }
 0x7d6   :  { %1780 = vrcp.f32 %v1059_v57 }
 0x7e0   :  { %v1775_v58 = vpop.eup %1774 }
 0x7e1   :  { %v1777_v59 = vpop.eup %1776 }
 0x7e2   :  { %v1779_v60 = vpop.eup %1778  ;;  %v1063_v61 = vmul.f32 %v1777_v59, %v1775_v58  ;;  %v2892_v58 = vld [vmem:[#allocation59_spill] sm:$0xff] }
 0x7e3   :  { %v1062_v62 = vmul.f32 %v1779_v60, %v2462_v51  ;;  %v1781_v1 = vpop.eup %1780 }
 0x7e5   :  { %v2594_v63 = vadd.f32 %v1063_v61, %v1062_v62 }
 0x7e7   :  { %1782 = vtanh.f32 %v2594_v63 }
 0x7f4   :  { %v1783_v2 = vpop.eup %1782 }
 0x7f5   :  { %v1066_v3 = vmul.f32 %v1783_v2, %v1781_v1 }
 0x7f7   :  { %v2600_v45 = vadd.f32 %v2597_v35, %v1066_v3 }
 0x7f9   :  { %1694 = vmatmul.mubr.f32.vlgmr.msra.gmra.mxu0 %v2600_v45 }
 0x7fa   :  { %1222 = vmatpush1.msra.mxu0 %v2177_v8  ;;  %1285 = vmatprep.mubr.f32.mxu0 %v2791_v32  ;;  %v2864_v8 = vld [vmem:[#allocation24_spill] sm:$0xff] }
 0x7fb   :  { %1223 = vmatprep.subr.mxu0 %v2181_v9  ;;  %v2865_v9 = vld [vmem:[#allocation25_spill] sm:$0xff] }
 0x7fc   :  { %1224 = vmatpush1.msra.mxu0 %v2184_v10  ;;  %v2866_v10 = vld [vmem:[#allocation26_spill] sm:$0xff] }
 0x7fd   :  { %1225 = vmatprep.subr.mxu0 %v2187_v11  ;;  %v2867_v11 = vld [vmem:[#allocation27_spill] sm:$0xff] }
 0x7fe   :  { %1226 = vmatpush1.msra.mxu0 %v2190_v12  ;;  %v2868_v12 = vld [vmem:[#allocation28_spill] sm:$0xff] }
 0x7ff   :  { %1227 = vmatprep.subr.mxu0 %v2193_v13  ;;  %v2869_v13 = vld [vmem:[#allocation29_spill] sm:$0xff] }
 0x800   :  { %1228 = vmatpush1.msra.mxu0 %v2196_v14  ;;  %v2870_v14 = vld [vmem:[#allocation56_spill] sm:$0xff] }
 0x801   :  { %1229 = vmatprep.subr.mxu0 %v2199_v15  ;;  %v2871_v15 = vld [vmem:[#allocation58_spill] sm:$0xff] }
 0x802   :  { %1230 = vmatpush1.msra.mxu0 %v2202_v16  ;;  %v2872_v16 = vld [vmem:[#allocation60_spill] sm:$0xff] }
 0x803   :  { %1231 = vmatprep.subr.mxu0 %v2205_v17 }
 0x804   :  { %1232 = vmatpush1.msra.mxu0 %v2208_v18 }
 0x805   :  { %1233 = vmatprep.subr.mxu0 %v2211_v19 }
 0x806   :  { %1234 = vmatpush1.msra.mxu0 %v2214_v20 }
 0x807   :  { %1235 = vmatprep.subr.mxu0 %v2217_v21 }
 0x808   :  { %1236 = vmatpush1.msra.mxu0 %v2220_v22 }
 0x809   :  { %1237 = vmatprep.subr.mxu0 %v2822_v33 }
 0x80a   :  { %1238 = vmatpush1.msra.mxu0 %v2823_v53 }
 0x80b   :  { %1239 = vmatprep.subr.mxu0 %v2824_v39 }
 0x80c   :  { %1240 = vmatpush1.msra.mxu0 %v2825_v40 }
 0x80d   :  { %1241 = vmatprep.subr.mxu0 %v2826_v42 }
 0x80e   :  { %1242 = vmatpush1.msra.mxu0 %v2827_v44 }
 0x80f   :  { %1243 = vmatprep.subr.mxu0 %v2828_v46  ;;  %v2873_v46 = vld [vmem:[#allocation32_spill] sm:$0xff] }
 0x810   :  { %1244 = vmatpush1.msra.mxu0 %v2864_v8 }
 0x811   :  { %1245 = vmatprep.subr.mxu0 %v2865_v9 }
 0x812   :  { %1246 = vmatpush1.msra.mxu0 %v2866_v10 }
 0x813   :  { %1247 = vmatprep.subr.mxu0 %v2867_v11 }
 0x814   :  { %1248 = vmatpush1.msra.mxu0 %v2868_v12 }
 0x815   :  { %1249 = vmatprep.subr.mxu0 %v2869_v13 }
 0x816   :  { %1250 = vmatpush1.msra.mxu0 %v2870_v14 }
 0x817   :  { %1251 = vmatprep.subr.mxu0 %v2871_v15 }
 0x818   :  { %1252 = vmatpush1.msra.mxu0 %v2872_v16 }
 0x8b9   :  { %v1134_v17 = vpop.f32.mrf.mxu0 }
 0x8ba   :  { %v1135_v18 = vadd.f32 %v1134_v17, %v2835_v56  ;;  %v2874_v56 = vld [vmem:[#allocation33_spill] sm:$0xff] }
 0x8bb   :  { %v1695_v19 = vpop.f32.mrf.mxu0 }
 0x8bc   :  { %1138 = vmax.xlane.f32.xlu0 %v1135_v18 }
 0x945   :  { %v1139_v20 = vpop.xlane.xlu0 %1138 }
 0x946   :  { %v1140_v21 = vsub.f32 %v1135_v18, %v1139_v20 }
 0x948   :  { %v1141_v22 = vmul.f32 1.442695, %v1140_v21 }
 0x94a   :  { %1784 = vpow2.f32 %v1141_v22 }
 0x957   :  { %v1785_v51 = vpop.eup %1784 }
 0x958   :  { %1143 = vadd.xlane.f32.xlu1 %v1785_v51 }
 0x9e1   :  { %v1144_v33 = vpop.xlane.xlu1 %1143 }
 0x9e2   :  { %1786 = vrcp.f32 %v1144_v33 }
 0x9ef   :  { %v1787_v53 = vpop.eup %1786 }
 0x9f0   :  { %v1146_v39 = vmul.f32 %v1787_v53, %v1144_v33 }
 0x9f2   :  { %v1147_v40 = vsub.f32 2.0, %v1146_v39 }
 0x9f4   :  { %v1148_v42 = vmul.f32 %v1787_v53, %v1147_v40 }
 0x9f6   :  { %v1149_v44 = vmul.f32 %v1785_v51, %v1148_v42 }
 0x9f8   :  { %1729 = vmatmul.mubr.f32.vlgmr.msra.gmra.mxu1 %v1149_v44 }
 0x9f9   :  { %1293 = vmatpush1.msra.mxu1 %v2264_v23  ;;  %1356 = vmatprep.mubr.f32.mxu1 %v2791_v32  ;;  %v2879_v23 = vld [vmem:[#allocation38_spill] sm:$0xff]  ;;  %v2880_v32 = vld [vmem:[#allocation39_spill] sm:$0xff] }
 0x9fa   :  { %1294 = vmatprep.subr.mxu1 %v2266_v0  ;;  %v2881_v0 = vld [vmem:[#allocation40_spill] sm:$0xff] }
 0x9fb   :  { %1295 = vmatpush1.msra.mxu1 %v2836_v55  ;;  %v2882_v55 = vld [vmem:[#allocation41_spill] sm:$0xff] }
 0x9fc   :  { %1296 = vmatprep.subr.mxu1 %v2837_v27  ;;  %v2883_v27 = vld [vmem:[#allocation42_spill] sm:$0xff] }
 0x9fd   :  { %1297 = vmatpush1.msra.mxu1 %v2873_v46 }
 0x9fe   :  { %1298 = vmatprep.subr.mxu1 %v2874_v56 }
 0x9ff   :  { %1299 = vmatpush1.msra.mxu1 %v2875_v4 }
 0xa00   :  { %1300 = vmatprep.subr.mxu1 %v2876_v37 }
 0xa01   :  { %1301 = vmatpush1.msra.mxu1 %v2877_v48 }
 0xa02   :  { %1302 = vmatprep.subr.mxu1 %v2878_v36 }
 0xa03   :  { %1303 = vmatpush1.msra.mxu1 %v2879_v23 }
 0xa04   :  { %1304 = vmatprep.subr.mxu1 %v2880_v32 }
 0xa05   :  { %1305 = vmatpush1.msra.mxu1 %v2881_v0 }
 0xa06   :  { %1306 = vmatprep.subr.mxu1 %v2882_v55 }
 0xa07   :  { %1307 = vmatpush1.msra.mxu1 %v2883_v27 }
 0xa08   :  { %1308 = vmatprep.subr.mxu1 %v2884_v5 }
 0xa09   :  { %1309 = vmatpush1.msra.mxu1 %v2885_v26 }
 0xa0a   :  { %1310 = vmatprep.subr.mxu1 %v2886_v28 }
 0xa0b   :  { %1311 = vmatpush1.msra.mxu1 %v2887_v6 }
 0xa0c   :  { %1312 = vmatprep.subr.mxu1 %v2853_v50 }
 0xa0d   :  { %1313 = vmatpush1.msra.mxu1 %v2854_v24 }
 0xa0e   :  { %1314 = vmatprep.subr.mxu1 %v2888_v29 }
 0xa0f   :  { %1315 = vmatpush1.msra.mxu1 %v2889_v7 }
 0xa10   :  { %1316 = vmatprep.subr.mxu1 %v2890_v30 }
 0xa11   :  { %1317 = vmatpush1.msra.mxu1 %v2891_v31 }
 0xa12   :  { %1318 = vmatprep.subr.mxu1 %v2859_v34 }
 0xa13   :  { %1319 = vmatpush1.msra.mxu1 %v2860_v47 }
 0xa14   :  { %1320 = vmatprep.subr.mxu1 %v2861_v49 }
 0xa15   :  { %1321 = vmatpush1.msra.mxu1 %v2862_v25 }
 0xa16   :  { %1322 = vmatprep.subr.mxu1 %v2892_v58 }
 0xa17   :  { %1323 = vmatpush1.msra.mxu1 %v2363_v54 }
 0xab8   :  { %v1216_v50 = vpop.f32.mrf.mxu1 }
 0xab9   :  { %v1220_v24 = vadd.f32 %v1216_v50, %v2600_v45 }
 0xaba   :  { %v1730_v59 = vpop.f32.mrf.mxu1 }
 0xabb   :  { %1286 = vmatmul.mubr.f32.vlgmr.msra.gmra.mxu0 %v1220_v24  ;;  %1357 = vmatmul.mubr.f32.vlgmr.msra.gmra.mxu1 %v1220_v24 }
 0xb7b   :  { %v1287_v60 = vpop.f32.mrf.mxu0  ;;  %v1358_v49 = vpop.f32.mrf.mxu1 }
 0xb7c   :  { %v1363_v57 = vadd.f32 %v1287_v60, %v2447_v41  ;;  %v1365_v3 = vadd.f32 %v1358_v49, %v2459_v38 }
 0xb7d   :  { %v1289_v34 = vpop.f32.mrf.mxu0  ;;  %v1360_v62 = vpop.f32.mrf.mxu1 }
 0xb7e   :  { %v1416_v61 = vmul.f32 -1.442695, %v1363_v57  ;;  %v1364_v47 = vadd.f32 %v1289_v34, %v2450_v43  ;;  %v1366_v54 = vadd.f32 %v1360_v62, %v2455_v52 }
 0xb80   :  { %1788 = vpow2.f32 %v1416_v61  ;;  %v1417_v25 = vmul.f32 -1.442695, %v1364_v47  ;;  %v1418_v1 = vmul.f32 -1.442695, %v1366_v54 }
 0xb82   :  { %1790 = vpow2.f32 %v1417_v25 }
 0xb83   :  { %1792 = vpow2.f32 %v1418_v1 }
 0xb8d   :  { %v1789_v2 = vpop.eup %1788 }
 0xb8e   :  { %v1370_v45 = vadd.f32 1.0, %v1789_v2 }
 0xb8f   :  { %v1791_v8 = vpop.eup %1790 }
 0xb90   :  { %1794 = vrcp.f32 %v1370_v45  ;;  %v1376_v41 = vadd.f32 1.0, %v1791_v8  ;;  %v1793_v9 = vpop.eup %1792 }
 0xb91   :  { %1796 = vtanh.f32 %v1365_v3  ;;  %v1383_v12 = vadd.f32 1.0, %v1793_v9 }
 0xb92   :  { %1798 = vrcp.f32 %v1376_v41 }
 0xb93   :  { %1800 = vrcp.f32 %v1383_v12 }
 0xb9d   :  { %v1795_v43 = vpop.eup %1794 }
 0xb9e   :  { %v1797_v10 = vpop.eup %1796 }
 0xb9f   :  { %v1799_v11 = vpop.eup %1798  ;;  %v1387_v13 = vmul.f32 %v1797_v10, %v1795_v43 }
 0xba0   :  { %v1386_v14 = vmul.f32 %v1799_v11, %v2594_v63  ;;  %v1801_v15 = vpop.eup %1800 }
 0xba2   :  { %v1388_v52 = vadd.f32 %v1387_v13, %v1386_v14 }
 0xba4   :  { %1802 = vtanh.f32 %v1388_v52 }
 0xbb1   :  { %v1803_v38 = vpop.eup %1802 }
 0xbb2   :  { %v1390_v16 = vmul.f32 %v1803_v38, %v1801_v15 }
 0xbb4   :  { %v1391_v17 = vadd.f32 %v2597_v35, %v1390_v16 }
 0xbb6   :  { %1392 = vst [vmem:[#allocation11] sm:$0xff] %v1391_v17 }
 0xbb7   :  { %1932 = shalt.err (!%p1929_p1)
}
 0xbb8   :  { %1402 = dma.vmem_to_hbm [thread:$0]  %s1400_s23, 128, %s2684_s6, [#allocation4]  }
 0xbb9   :  { %1947 = dma.done.wait [#allocation4], 128  }
 0xbba   :  { %1948 = vsyncadd [#allocation4], 4294967168 }
 0xbbb   :  { %1406 = vsyncpa [#allocation3], 1 }
 0xbbc   :  { %1407 = vsyncpa [#allocation6], 1 }
 0xbbd   :  { %1408 = vsyncpa [#allocation9], 1 }
 0xbbe   :  { %1409 = vsyncpa [#allocation4], 1 }

</bundles_post_ra>
